<compile_context>
chip_gen: v7x
topology: tpu7x:2x2x1
jax: 0.10.0
libtpu: 0.0.40
codegen_flags: <defaults>
</compile_context>

<pallas_src>
import jax
import jax.numpy as jnp
from jax import lax
from jax.experimental import pallas as pl
from jax.experimental.pallas import tpu as pltpu

EPS = 1e-5


def gemm_scale_bn_kernel(x_ref, w_ref, params_ref, o_ref):
    # x_ref:      (M, K)   full batch (constant block index -> DMA'd once, resident)
    # w_ref:      (K, TN)  feature tile of the transposed weight
    # params_ref: (3, TN)  rows = [scale*gamma, scale^2, bn beta]
    # o_ref:      (M, TN)  output tile
    z = jnp.dot(x_ref[...], w_ref[...], preferred_element_type=jnp.float32)

    p = params_ref[...]
    sg = p[0:1, :]       # scale * gamma
    s2 = p[1:2, :]       # scale * scale
    beta = p[2:3, :]

    # BatchNorm1d (training mode) on the *raw* matmul output; bias/scale are folded away.
    mean = jnp.mean(z, axis=0, keepdims=True)
    centered = z - mean
    var = jnp.mean(centered * centered, axis=0, keepdims=True)   # biased variance
    bn_scale = sg * lax.rsqrt(s2 * var + EPS)                    # one rsqrt per feature (EUP)

    o_ref[...] = (centered * bn_scale + beta).astype(o_ref.dtype)


def gemm_scale_bn(x, w_t, bias, scale, gamma, beta, *, tn=128, use_bf16=True):
    """x: (M, K), w_t: (K, N), bias/scale/gamma/beta: (N,) -> (M, N) f32.

    `bias` is accepted for API parity with nn.Linear but is mathematically cancelled by
    the BatchNorm mean subtraction, so it never reaches the kernel.
    """
    del bias  # exactly cancelled by BN mean subtraction
    M, K = x.shape
    Kw, N = w_t.shape
    assert K == Kw

    # Pick a lane-dense feature tile that divides N; only collapse to N as a last resort.
    if N % tn != 0:
        for cand in (256, 128):
            if N % cand == 0:
                tn = cand
                break
        else:
            tn = N

    in_dtype = jnp.bfloat16 if use_bf16 else x.dtype
    x_in = x.astype(in_dtype)
    w_in = w_t.astype(in_dtype)

    # Fuse the per-feature vectors into a single (3, N) slab: [scale*gamma, scale^2, beta].
    params = jnp.stack(
        [scale * gamma, scale * scale, beta], axis=0
    ).astype(jnp.float32)

    grid = (N // tn,)
    in_bytes = 2 if use_bf16 else 4
    cost = pl.CostEstimate(
        flops=2 * M * K * N,
        transcendentals=N,  # one rsqrt per output feature
        bytes_accessed=in_bytes * (M * K + K * N) + 4 * (M * N + 3 * N),
    )

    return pl.pallas_call(
        gemm_scale_bn_kernel,
        out_shape=jax.ShapeDtypeStruct((M, N), jnp.float32),
        grid_spec=pltpu.PrefetchScalarGridSpec(
            num_scalar_prefetch=0,
            grid=grid,
            in_specs=[
                pl.BlockSpec((M, K), lambda j: (0, 0)),    # x: whole batch, reused every tile
                pl.BlockSpec((K, tn), lambda j: (0, j)),   # W^T feature tile
                pl.BlockSpec((3, tn), lambda j: (0, j)),   # fused per-feature params
            ],
            out_specs=pl.BlockSpec((M, tn), lambda j: (0, j)),
        ),
        compiler_params=pltpu.CompilerParams(
            dimension_semantics=("parallel",),   # N-tiles shard across v7x's 2 TensorCores
        ),
        cost_estimate=cost,
    )(x_in, w_in, params)


def reference(x, w_t, bias, scale, gamma, beta):
    z = x @ w_t + bias
    z = z * scale
    mean = jnp.mean(z, axis=0, keepdims=True)
    var = jnp.mean((z - mean) ** 2, axis=0, keepdims=True)
    return (z - mean) / jnp.sqrt(var + EPS) * gamma + beta


if __name__ == "__main__":
    # Shapes from the module spec: in_features=1024, out_features=512; batch=128.
    batch = 128
    in_features = 1024
    out_features = 512

    key = jax.random.PRNGKey(0)
    kx, kw, kb, ks = jax.random.split(key, 4)

    x = jax.random.normal(kx, (batch, in_features), dtype=jnp.float32)

    # Deterministic parameter init (shapes match nn.Linear / scale Parameter / nn.BatchNorm1d)
    bound = 1.0 / (in_features ** 0.5)
    weight = jax.random.uniform(kw, (out_features, in_features),
                                minval=-bound, maxval=bound, dtype=jnp.float32)
    bias = jax.random.uniform(kb, (out_features,),
                              minval=-bound, maxval=bound, dtype=jnp.float32)
    scale = jax.random.normal(ks, (out_features,), dtype=jnp.float32)
    gamma = jnp.ones((out_features,), dtype=jnp.float32)   # BN weight default
    beta = jnp.zeros((out_features,), dtype=jnp.float32)   # BN bias default

    w_t = weight.T  # (in_features, out_features)

    ref = reference(x, w_t, bias, scale, gamma, beta)

    # f32 path: tight check of the folded-BN algebra against the unfused reference.
    out_f32 = jax.block_until_ready(
        gemm_scale_bn(x, w_t, bias, scale, gamma, beta, use_bf16=False))
    assert out_f32.shape == (batch, out_features)
    assert jnp.allclose(out_f32, ref, atol=2e-3, rtol=2e-3), "f32 kernel mismatch vs reference"

    # bf16 path (default; halves HBM traffic): BN output is O(1), so loosened tolerance.
    out_bf16 = jax.block_until_ready(
        gemm_scale_bn(x, w_t, bias, scale, gamma, beta))
    assert out_bf16.shape == (batch, out_features)
    assert jnp.allclose(out_bf16, ref, atol=5e-2, rtol=5e-2), "bf16 kernel mismatch vs reference"

    print("KERNEL_OK")
</pallas_src>

<mosaic_0001>
module attributes {stable_mosaic.version = 11 : i64} {
  func.func @gemm_scale_bn_kernel(%arg0: i32, %arg1: memref<128x1024xf32, #tpu.memory_space<vmem>>, %arg2: memref<1024x128xf32, #tpu.memory_space<vmem>>, %arg3: memref<3x128xf32, #tpu.memory_space<vmem>>, %arg4: memref<128x128xf32, #tpu.memory_space<vmem>>) attributes {dimension_semantics = [#tpu.dimension_semantics<parallel>], iteration_bounds = array<i64: 4>, scalar_prefetch = 0 : i64, scratch_operands = 0 : i64, tpu.core_type = #tpu.core_type<tc>, window_params = [{pipeline_mode = #tpu.pipeline_mode<synchronous>, transform_indices = @transform_0, window_bounds = array<i64: 128, 1024>}, {transform_indices = @transform_1, window_bounds = array<i64: 1024, 128>}, {transform_indices = @transform_2, window_bounds = array<i64: 3, 128>}, {transform_indices = @transform_3, window_bounds = array<i64: 128, 128>}]} {
    %c0 = arith.constant 0 : index
    %c0_0 = arith.constant 0 : index
    %0 = vector.load %arg1[%c0, %c0_0] : memref<128x1024xf32, #tpu.memory_space<vmem>>, vector<128x1024xf32>
    %c0_1 = arith.constant 0 : index
    %c0_2 = arith.constant 0 : index
    %1 = vector.load %arg2[%c0_1, %c0_2] : memref<1024x128xf32, #tpu.memory_space<vmem>>, vector<1024x128xf32>
    %cst = arith.constant dense<0.000000e+00> : vector<128x128xf32>
    %2 = tpu.matmul %0, %1, %cst {dimension_numbers = #tpu.dot_dimension_numbers<[1], [0], [0], [1], [0, 0, 1, 1], [], []>} : vector<128x1024xf32>, vector<1024x128xf32>, vector<128x128xf32> -> vector<128x128xf32>
    %c0_3 = arith.constant 0 : index
    %c0_4 = arith.constant 0 : index
    %3 = vector.load %arg3[%c0_3, %c0_4] : memref<3x128xf32, #tpu.memory_space<vmem>>, vector<3x128xf32>
    %4 = vector.extract_strided_slice %3 {offsets = [0, 0], sizes = [1, 128], strides = [1, 1]} : vector<3x128xf32> to vector<1x128xf32>
    %5 = vector.extract_strided_slice %3 {offsets = [1, 0], sizes = [1, 128], strides = [1, 1]} : vector<3x128xf32> to vector<1x128xf32>
    %6 = vector.extract_strided_slice %3 {offsets = [2, 0], sizes = [1, 128], strides = [1, 1]} : vector<3x128xf32> to vector<1x128xf32>
    %cst_5 = arith.constant dense<0.000000e+00> : vector<128xf32>
    %7 = vector.multi_reduction <add>, %2, %cst_5 [0] : vector<128x128xf32> to vector<128xf32>
    %8 = vector.shape_cast %7 : vector<128xf32> to vector<1x128xf32>
    %cst_6 = arith.constant 1.280000e+02 : f32
    %9 = vector.broadcast %cst_6 : f32 to vector<1x128xf32>
    %10 = arith.divf %8, %9 : vector<1x128xf32>
    %11 = vector.broadcast %10 : vector<1x128xf32> to vector<128x128xf32>
    %12 = arith.subf %2, %11 : vector<128x128xf32>
    %13 = arith.mulf %12, %12 : vector<128x128xf32>
    %cst_7 = arith.constant dense<0.000000e+00> : vector<128xf32>
    %14 = vector.multi_reduction <add>, %13, %cst_7 [0] : vector<128x128xf32> to vector<128xf32>
    %15 = vector.shape_cast %14 : vector<128xf32> to vector<1x128xf32>
    %cst_8 = arith.constant 1.280000e+02 : f32
    %16 = vector.broadcast %cst_8 : f32 to vector<1x128xf32>
    %17 = arith.divf %15, %16 : vector<1x128xf32>
    %18 = arith.mulf %5, %17 : vector<1x128xf32>
    %cst_9 = arith.constant 9.99999974E-6 : f32
    %19 = vector.broadcast %cst_9 : f32 to vector<1x128xf32>
    %20 = arith.addf %18, %19 : vector<1x128xf32>
    %21 = math.rsqrt %20 : vector<1x128xf32>
    %22 = arith.mulf %4, %21 : vector<1x128xf32>
    %23 = vector.broadcast %22 : vector<1x128xf32> to vector<128x128xf32>
    %24 = arith.mulf %12, %23 : vector<128x128xf32>
    %25 = vector.broadcast %6 : vector<1x128xf32> to vector<128x128xf32>
    %26 = arith.addf %24, %25 : vector<128x128xf32>
    %c0_10 = arith.constant 0 : index
    %c0_11 = arith.constant 0 : index
    %27 = vector.load %arg4[%c0_10, %c0_11] : memref<128x128xf32, #tpu.memory_space<vmem>>, vector<128x128xf32>
    tpu.vector_store %arg4[%c0_10, %c0_11], %26 {strides = array<i32>} : memref<128x128xf32, #tpu.memory_space<vmem>>, vector<128x128xf32>,
    return
  }
  func.func @transform_0(%arg0: i32) -> (i32, i32) {
    %c0_i32 = arith.constant 0 : i32
    %c0_i32_0 = arith.constant 0 : i32
    %c0_i32_1 = arith.constant 0 : i32
    return %c0_i32, %c0_i32_0 : i32, i32
  }
  func.func @transform_1(%arg0: i32) -> (i32, i32) {
    %c0_i32 = arith.constant 0 : i32
    %c0_i32_0 = arith.constant 0 : i32
    return %c0_i32, %arg0 : i32, i32
  }
  func.func @transform_2(%arg0: i32) -> (i32, i32) {
    %c0_i32 = arith.constant 0 : i32
    %c0_i32_0 = arith.constant 0 : i32
    return %c0_i32, %arg0 : i32, i32
  }
  func.func @transform_3(%arg0: i32) -> (i32, i32) {
    %c0_i32 = arith.constant 0 : i32
    %c0_i32_0 = arith.constant 0 : i32
    return %c0_i32, %arg0 : i32, i32
  }
}

</mosaic_0001>

<bundles_post_ra>
// kernel: tpu_custom_call.1
= control target key start
LH: loop header
LB: loop body
LE: loop exit
PB: predicated region body
PF: predicated region fallthrough
CT: control target
= control target key end

     0   :  { %8 = vsyncpa [#allocation3], 0  ;;  %s2620_s0 = inlined_call_operand.hbm [shape: f32[128,1024], index: 0, kind: input, shape index: {}]   ;;  %s2621_s1 = inlined_call_operand.hbm [shape: f32[1024,512], index: 1, kind: input, shape index: {}]   ;;  %s2622_s2 = inlined_call_operand.hbm [shape: f32[3,512], index: 2, kind: input, shape index: {}]   ;;  %s2623_s3 = inlined_call_operand.hbm [shape: f32[128,512], index: 3, kind: output, shape index: {}]  }
   0x1   :  { %9 = vsyncpa [#allocation6], 0 }
   0x2   :  { %11 = vsyncpa [#allocation6 + $0x1], 0 }
   0x3   :  { %12 = vsyncpa [#allocation4], 0 }
   0x4   :  { %14 = vsyncpa [#allocation4 + $0x1], 0  ;;  %s2061_s12 = smov 0   ;;  %s2063_s13 = smov 0  }
   0x5   :  { %s2065_s14 = smov 0   ;;  %s2067_s15 = smov 0  }
   0x6 LB: > { %s2082_s16 = sadd.s32 1, %s2027_s15   ;;  %s48_s17 = sadd.s32 1, %s2023_s14  ;;  %s2027_s15 = sphi %s2067_s15, %s2649_s15   ;;  %s2023_s14 = sphi %s2065_s14, %s2648_s14   ;;  %s2019_s13 = sphi %s2063_s13, %s2647_s13   ;;  %s2015_s12 = sphi %s2061_s12, %s2646_s12  }
   0x7   : > { %s45_s18 = ssub.s32 %s2027_s15, %s2082_s16  ;;  %p55_p0 = scmp.ne.s32.totalorder %s2023_s14, %s2019_s13 }
   0x8   : > { %p46_p1 = scmp.eq.s32.totalorder %s45_s18, 0  ;;  %p56_p2 = scmp.eq.s32.totalorder %s2027_s15, 0 }
   0x9   : > { %p1823_p3 = scmp.lt.s32.totalorder %s2027_s15, 4  ;;  %s150_s20 = sand.u32 1, %s2027_s15  }
   0xa   : > { %s2092_s19 = scalar_select %p46_p1, %s2023_s14, %s48_s17  }
   0xb   : > { %p57_p4 = por %p56_p2, %p55_p0  ;;  %s152_s21 = sand.u32 1, %s2023_s14  }
   0xc   : > { %s1336_s22 = sshll.u32 %s152_s21, 10  ;;  %s1337_s23 = sshll.u32 %s2027_s15, 7 }
   0xd   : > { %s2105_s26 = scalar_lea.hbm %s2621_s1, %s1337_s23  ;;  %s154_s27 = scalar_lea.vmem [#allocation5], %s1336_s22 }
   0xe   : > { %s160_s28 = sshll.u32 %s154_s27, 4  ;;  %p2107_p5 = pnand %p1823_p3, %p57_p4  ;;  %s2111_s28 = int_to_ptr.vmem [resolvable:$true] %s160_s28 }
   0xf   : > { %s2113_s30 = scalar_lea.sflag [#allocation6], %s150_s20  ;;  %s1869_s4 = scalar_lea.hbm %s2105_s26, 16384 }
  0x10   : > { %s2631_s29 = scalar_select %p2107_p5, 1, 0 }
  0x11   : > { %p1870_p6 = scmp.ne.s32.totalorder %s2105_s26, %s1869_s4  ;;  %p2625_p7 = pneg %p2107_p5 }
  0x12   : > { %s1874_s7 = scalar_lea.hbm %s2621_s1, 65536  ;;  %p1875_p10 = scmp.lt.u32.totalorder %s2105_s26, %s2621_s1 }
  0x13   : > { %p1872_p8 = pnand %p2625_p7, %p1870_p6  ;;  %p1876_p11 = scmp.lt.u32.totalorder %s1874_s7, %s1869_s4 }
  0x14   : > { %p1878_p13 = scmp.lt.u32.totalorder %s1869_s4, %s2105_s26 }
  0x15   : > { %p1873_p9 = pneg %p1872_p8  ;;  %p1877_p12 = por %p1876_p11, %p1875_p10 }
  0x17   : > { %p1879_p1 = por %p1878_p13, %p1877_p12 }
  0x19   : > { %p1880_p2 = pnand %p1879_p1, %p1873_p9 }
  0x1b   : > { %1883 = shalt.err (!%p1880_p2)
}
  0x1c   : > { %s1884_s10 = scalar_lea.vmem %s2111_s28, 16384  ;;  %s2029_s11 = smov [#allocation5]  }
  0x1d   : > { %p1885_p3 = scmp.ne.s32.totalorder %s2111_s28, %s1884_s10  ;;  %s1889_s17 = sshll.u32 %s2029_s11, 4  ;;  %s1890_s17 = int_to_ptr.vmem [resolvable:$false] %s1889_s17 }
  0x1e   : > { %s1891_s18 = scalar_lea.vmem %s1890_s17, 32768  ;;  %p1892_p8 = scmp.lt.s32.totalorder %s2111_s28, %s1890_s17 }
  0x1f   : > { %p1887_p4 = pnand %p1885_p3, %p2625_p7  ;;  %p1893_p10 = scmp.lt.s32.totalorder %s1891_s18, %s1884_s10 }
  0x21   : > { %p1888_p6 = pneg %p1887_p4  ;;  %p1894_p11 = por %p1893_p10, %p1892_p8 }
  0x23   : > { %p1895_p12 = pnand %p1894_p11, %p1888_p6 }
  0x25   : > { %1898 = shalt.err (!%p1895_p12)
}
  0x26   : > { %s2030_s20 = smov 512   ;;  %s2031_s22 = smov 128  }
  0x27   : > { %s2032_s23 = smov 8   ;;  %s2142_s24 = sadd.s32 4294967295, %s2027_s15  }
  0x28   : > { %1814 = dma.hbm_to_vmem [thread:$0]  (!%p2107_p5), %s2105_s26, 16384, %s2111_s28, %s2113_s30, %s2030_s20, %s2031_s22, %s2032_s23  }
  0x29   : > { %s1332_s25 = sadd.s32 4294967294, %s2027_s15   ;;  %p61_p9 = scmp.ne.s32.totalorder %s2019_s13, %s2015_s12 }
  0x2a   : > { %p2624_p13 = scmp.eq.s32.totalorder %s2142_s24, 0  ;;  %p111_p1 = scmp.eq.s32.totalorder %s2142_s24, 3 }
  0x2b   : > { %p117_p2 = scmp.eq.s32.totalorder %s1332_s25, 3  ;;  %p1333_p3 = scmp.ge.s32.totalorder %s2027_s15, 1 }
  0x2c   : > { %p2152_p4 = por %p2624_p13, %p61_p9  ;;  %p2159_p6 = por %p111_p1, %p55_p0 }
  0x2d   : > { %p2163_p8 = por %p117_p2, %p61_p9  ;;  %p124_p10 = scmp.lt.s32.totalorder %s2027_s15, 5 }
  0x2e   : > { %s2632_s27 = scalar_select %p2152_p4, 1, 0 }
  0x2f   : > { %s2633_s26 = scalar_select %p2159_p6, 1, 0 }
  0x30   : > { %s2634_s28 = scalar_select %p2163_p8, 1, 0 }
  0x31   : > { %p2168_p11 = pnand %p1333_p3, %p124_p10  ;;  %s2033_s5 = smov [#allocation2]  }
  0x32   : > { %s136_s6 = sshll.u32 %s2033_s5, 4  ;;  %s1338_s7 = sshll.u32 %s152_s21, 2  ;;  %s2172_s6 = int_to_ptr.vmem [resolvable:$true] %s136_s6 }
  0x33   : > { %s2635_s4 = scalar_select %p2168_p11, 1, 0 }
  0x34   : > { %p1807_p12 = pneg %p2168_p11  ;;  %s1339_s8 = sshll.u32 %s2027_s15, 6 }
  0x35   : > { %s2188_s17 = scalar_lea.hbm %s2622_s2, %s1339_s8  ;;  %s174_s18 = scalar_lea.vmem [#allocation7], %s1338_s7 }
  0x36   : > { %p2181_p0 = pnand %p1807_p12, %p2624_p13  ;;  %s181_s20 = sshll.u32 %s174_s18, 4  ;;  %s2190_s20 = int_to_ptr.vmem [resolvable:$true] %s181_s20 }
  0x37   : > { %s1899_s21 = scalar_lea.hbm %s2620_s0, 16384 }
  0x38   : > { %p1900_p9 = scmp.ne.s32.totalorder %s2620_s0, %s1899_s21  ;;  %p1901_p1 = pneg %p2181_p0 }
  0x39   : > { %p1906_p10 = scmp.lt.u32.totalorder %s1899_s21, %s2620_s0 }
  0x3a   : > { %p1902_p2 = pnand %p1901_p1, %p1900_p9 }
  0x3c   : > { %p1903_p3 = pneg %p1902_p2 }
  0x3e   : > { %p1908_p12 = pnand %p1906_p10, %p1903_p3 }
  0x40   : > { %1911 = shalt.err (!%p1908_p12)
}
  0x41   : > { %s1912_s7 = scalar_lea.vmem %s2172_s6, 16384  ;;  %p1920_p6 = scmp.lt.s32.totalorder %s2172_s6, %s2172_s6 }
  0x42   : > { %p1913_p13 = scmp.ne.s32.totalorder %s2172_s6, %s1912_s7  ;;  %p1921_p4 = scmp.lt.s32.totalorder %s1912_s7, %s1912_s7 }
  0x44   : > { %p1915_p7 = pnand %p1913_p13, %p1901_p1  ;;  %p1922_p11 = por %p1921_p4, %p1920_p6 }
  0x46   : > { %p1916_p8 = pneg %p1915_p7 }
  0x48   : > { %p1923_p5 = pnand %p1922_p11, %p1916_p8 }
  0x4a   : > { %1926 = shalt.err (!%p1923_p5)
}
  0x4b   : > { %s2034_s8 = smov 1024   ;;  %s2035_s18 = smov 64  }
  0x4c   : > { %1810 = dma.hbm_to_vmem [thread:$0]  (!%p2181_p0), %s2620_s0, 16384, %s2172_s6, [#allocation3], %s2034_s8, %s2034_s8, %s2035_s18  }
  0x4d   : > { %s1927_s21 = scalar_lea.hbm %s2188_s17, 64  ;;  %p2637_p13 = scmp.ne.s32.totalorder %s2631_s29, 0 }
  0x4e   : > { %p1928_p7 = scmp.ne.s32.totalorder %s2188_s17, %s1927_s21  ;;  %s1932_s10 = scalar_lea.hbm %s2622_s2, 256 }
  0x4f   : > { %p2638_p4 = pneg %p2637_p13  ;;  %p1933_p8 = scmp.lt.u32.totalorder %s2188_s17, %s2622_s2 }
  0x50   : > { %p1934_p11 = scmp.lt.u32.totalorder %s1932_s10, %s1927_s21  ;;  %p1936_p1 = scmp.lt.u32.totalorder %s1927_s21, %s2188_s17 }
  0x51   : > { %p1930_p6 = pnand %p1928_p7, %p2638_p4 }
  0x52   : > { %p1935_p9 = por %p1934_p11, %p1933_p8 }
  0x53   : > { %p1931_p5 = pneg %p1930_p6 }
  0x54   : > { %p1937_p2 = por %p1936_p1, %p1935_p9 }
  0x56   : > { %p1938_p3 = pnand %p1937_p2, %p1931_p5 }
  0x58   : > { %1941 = shalt.err (!%p1938_p3)
}
  0x59   : > { %s1942_s6 = scalar_lea.vmem %s2190_s20, 64  ;;  %p2639_p10 = pmov %p2638_p4 }
  0x5a   : > { %p1943_p0 = scmp.ne.s32.totalorder %s2190_s20, %s1942_s6  ;;  %s2036_s9 = smov [#allocation7]  }
  0x5b   : > { %s1947_s8 = sshll.u32 %s2036_s9, 4  ;;  %s1948_s8 = int_to_ptr.vmem [resolvable:$false] %s1947_s8 }
  0x5c   : > { %p1945_p12 = pnand %p1943_p0, %p2639_p10  ;;  %s1949_s18 = scalar_lea.vmem %s1948_s8, 128 }
  0x5d   : > { %p1950_p4 = scmp.lt.s32.totalorder %s2190_s20, %s1948_s8  ;;  %p1951_p6 = scmp.lt.s32.totalorder %s1949_s18, %s1942_s6 }
  0x5e   : > { %p1946_p7 = pneg %p1945_p12 }
  0x5f   : > { %p1952_p8 = por %p1951_p6, %p1950_p4 }
  0x61   : > { %p1953_p11 = pnand %p1952_p8, %p1946_p7 }
  0x63   : > { %1956 = shalt.err (!%p1953_p11)
}
  0x64   : > { %1817 = dma.hbm_to_vmem [thread:$0]  (!%p2637_p13), %s2188_s17, 64, %s2190_s20, %s2113_s30  }
  0x65   : > { %p2640_p5 = scmp.ne.s32.totalorder %s2635_s4, 0 }
  0x66   : > { %p2641_p9 = scmp.eq.s32.totalorder (!%p2640_p5), %s2142_s24, 0 }
  0x67   : > { %190 = sbr.rel (%p2640_p5) target bundleno = 612 (0x264), region = 32 }
  0x6e   : > { %2002 = dma.done.wait (%p2641_p9), [#allocation3], 16384   ;;  %p2642_p1 = pmov %p2641_p9 }
  0x6f   : > { %s196_s22 = sand.u32 1, %s2142_s24   ;;  %s2245_s23 = sand.u32 1, %s2019_s13  }
  0x70   : > { %2004 = vsyncadd (%p2642_p1), [#allocation3], 4294950912  ;;  %s1342_s29 = sshll.u32 %s2245_s23, 10  ;;  %s197_s21 = scalar_lea.sflag [#allocation6], %s196_s22 }
  0x71   : > { %s2248_s25 = scalar_lea.vmem [#allocation5], %s1342_s29  ;;  %p2643_p13 = scmp.ne.s32.totalorder %s2632_s27, 0 }
  0x73   : > { %2006 = dma.done.wait (%p2643_p13), %s197_s21, 16448  }
  0x74   : > { %2008 = vsyncadd (%p2643_p13), %s197_s21, 4294950848  ;;  %v381_v0 = vld [vmem:[%s2248_s25 + $0x80] sm:$0xff]  ;;  %v382_v1 = vld [vmem:[%s2248_s25 + $0x88] sm:$0xff]  ;;  %s1343_s30 = sshll.u32 %s2245_s23, 2  ;;  %s1344_s4 = sshll.u32 %s2245_s23, 7 }
  0x75   : > { %v413_v2 = vld [vmem:[%s2248_s25 + $0x180] sm:$0xff]  ;;  %v1669_v3 = vpack.c.bf16 %v382_v1, %v381_v0  ;;  %v414_v4 = vld [vmem:[%s2248_s25 + $0x188] sm:$0xff]  ;;  %v383_v11 = vld [vmem:[%s2248_s25 + $0x90] sm:$0xff]  ;;  %s209_s27 = scalar_lea.vmem [#allocation7], %s1343_s30  ;;  %s1346_s17 = sshll.u32 %s2142_s24, 7 }
  0x76   : > { %v365_v5 = vld [vmem:[%s2248_s25] sm:$0xff]  ;;  %v366_v6 = vld [vmem:[%s2248_s25 + $0x8] sm:$0xff]  ;;  %v1701_v7 = vpack.c.bf16 %v414_v4, %v413_v2  ;;  %v384_v13 = vld [vmem:[%s2248_s25 + $0x98] sm:$0xff]  ;;  %s2553_s20 = scalar_lea.vmem [#allocation8], %s1344_s4  ;;  %s2559_s11 = scalar_lea.hbm %s2623_s3, %s1346_s17 }
  0x77   : > { %v1671_v8 = vpack.c.bf16 %v366_v6, %v365_v5  ;;  %v397_v9 = vld [vmem:[%s2248_s25 + $0x100] sm:$0xff]  ;;  %v398_v10 = vld [vmem:[%s2248_s25 + $0x108] sm:$0xff]  ;;  %1670 = vmatprep.subr.bf16.mxu0 %v1669_v3  ;;  %v415_v14 = vld [vmem:[%s2248_s25 + $0x190] sm:$0xff]  ;;  %v1673_v16 = vpack.c.bf16 %v384_v13, %v383_v11  ;;  %s1227_s5 = sshll.u32 %s2553_s20, 4  ;;  %s1215_s7 = scalar_lea.sflag [#allocation4], %s2245_s23  ;;  %s2565_s5 = int_to_ptr.vmem [resolvable:$true] %s1227_s5 }
  0x78   : > { %v1703_v12 = vpack.c.bf16 %v398_v10, %v397_v9  ;;  %v416_v15 = vld [vmem:[%s2248_s25 + $0x198] sm:$0xff]  ;;  %1702 = vmatprep.subr.bf16.mxu1 %v1701_v7  ;;  %v367_v18 = vld [vmem:[%s2248_s25 + $0x10] sm:$0xff]  ;;  %v385_v23 = vld [vmem:[%s2248_s25 + $0xa0] sm:$0xff]  ;;  %s1957_s6 = scalar_lea.vmem %s2565_s5, 2048  ;;  %p2644_p3 = scmp.ne.s32.totalorder %s2633_s26, 0 }
  0x79   : > { %1672 = vmatpush3.bf16.msra.mxu0 %v1671_v8  ;;  %v1705_v17 = vpack.c.bf16 %v416_v15, %v415_v14  ;;  %v368_v19 = vld [vmem:[%s2248_s25 + $0x18] sm:$0xff]  ;;  %v399_v20 = vld [vmem:[%s2248_s25 + $0x110] sm:$0xff]  ;;  %v386_v24 = vld [vmem:[%s2248_s25 + $0xa8] sm:$0xff]  ;;  %p1958_p2 = scmp.ne.s32.totalorder %s2565_s5, %s1957_s6  ;;  %s2037_s9 = smov [#allocation8]  }
  0x7a   : > { %1704 = vmatpush3.bf16.msra.mxu1 %v1703_v12  ;;  %v1675_v21 = vpack.c.bf16 %v368_v19, %v367_v18  ;;  %v400_v22 = vld [vmem:[%s2248_s25 + $0x118] sm:$0xff]  ;;  %1674 = vmatprep.subr.bf16.mxu0 %v1673_v16  ;;  %v1677_v26 = vpack.c.bf16 %v386_v24, %v385_v23  ;;  %v417_v27 = vld [vmem:[%s2248_s25 + $0x1a0] sm:$0xff]  ;;  %v418_v28 = vld [vmem:[%s2248_s25 + $0x1a8] sm:$0xff]  ;;  %s1961_s8 = sshll.u32 %s2037_s9, 4  ;;  %s1962_s8 = int_to_ptr.vmem [resolvable:$false] %s1961_s8 }
  0x7b   : > { %1706 = vmatprep.subr.bf16.mxu1 %v1705_v17  ;;  %v1707_v25 = vpack.c.bf16 %v400_v22, %v399_v20  ;;  %v369_v29 = vld [vmem:[%s2248_s25 + $0x20] sm:$0xff]  ;;  %v1709_v30 = vpack.c.bf16 %v418_v28, %v417_v27  ;;  %v370_v31 = vld [vmem:[%s2248_s25 + $0x28] sm:$0xff]  ;;  %v387_v35 = vld [vmem:[%s2248_s25 + $0xb0] sm:$0xff]  ;;  %p1959_p0 = pnand %p1958_p2, %p2644_p3  ;;  %s1963_s18 = scalar_lea.vmem %s1962_s8, 4096 }
  0x7c   : > { %v401_v32 = vld [vmem:[%s2248_s25 + $0x120] sm:$0xff]  ;;  %v402_v33 = vld [vmem:[%s2248_s25 + $0x128] sm:$0xff]  ;;  %v1679_v34 = vpack.c.bf16 %v370_v31, %v369_v29  ;;  %v388_v36 = vld [vmem:[%s2248_s25 + $0xb8] sm:$0xff]  ;;  %p1964_p12 = scmp.lt.s32.totalorder %s2565_s5, %s1962_s8  ;;  %p1965_p7 = scmp.lt.s32.totalorder %s1963_s18, %s1957_s6 }
  0x7d   : > { %1676 = vmatpush3.bf16.msra.mxu0 %v1675_v21  ;;  %v419_v37 = vld [vmem:[%s2248_s25 + $0x1b0] sm:$0xff]  ;;  %v1711_v38 = vpack.c.bf16 %v402_v33, %v401_v32  ;;  %v1681_v39 = vpack.c.bf16 %v388_v36, %v387_v35  ;;  %v420_v40 = vld [vmem:[%s2248_s25 + $0x1b8] sm:$0xff]  ;;  %v389_v46 = vld [vmem:[%s2248_s25 + $0xc0] sm:$0xff]  ;;  %p1960_p10 = pneg %p1959_p0 }
  0x7e   : > { %1708 = vmatpush3.bf16.msra.mxu1 %v1707_v25  ;;  %1678 = vmatprep.subr.bf16.mxu0 %v1677_v26  ;;  %v371_v41 = vld [vmem:[%s2248_s25 + $0x30] sm:$0xff]  ;;  %v372_v42 = vld [vmem:[%s2248_s25 + $0x38] sm:$0xff]  ;;  %v1713_v43 = vpack.c.bf16 %v420_v40, %v419_v37  ;;  %v390_v47 = vld [vmem:[%s2248_s25 + $0xc8] sm:$0xff]  ;;  %p1966_p4 = por %p1965_p7, %p1964_p12 }
  0x7f   : > { %1710 = vmatprep.subr.bf16.mxu1 %v1709_v30  ;;  %v403_v44 = vld [vmem:[%s2248_s25 + $0x130] sm:$0xff]  ;;  %v404_v45 = vld [vmem:[%s2248_s25 + $0x138] sm:$0xff]  ;;  %v421_v48 = vld [vmem:[%s2248_s25 + $0x1c0] sm:$0xff]  ;;  %v1683_v50 = vpack.c.bf16 %v372_v42, %v371_v41  ;;  %v1685_v52 = vpack.c.bf16 %v390_v47, %v389_v46 }
  0x80   : > { %v422_v49 = vld [vmem:[%s2248_s25 + $0x1c8] sm:$0xff]  ;;  %v1715_v51 = vpack.c.bf16 %v404_v45, %v403_v44  ;;  %v373_v53 = vld [vmem:[%s2248_s25 + $0x40] sm:$0xff]  ;;  %v391_v58 = vld [vmem:[%s2248_s25 + $0xd0] sm:$0xff]  ;;  %p1967_p6 = pnand %p1966_p4, %p1960_p10 }
  0x81   : > { %1680 = vmatpush3.bf16.msra.mxu0 %v1679_v34  ;;  %v374_v54 = vld [vmem:[%s2248_s25 + $0x48] sm:$0xff]  ;;  %v405_v55 = vld [vmem:[%s2248_s25 + $0x140] sm:$0xff]  ;;  %v1717_v56 = vpack.c.bf16 %v422_v49, %v421_v48  ;;  %v392_v59 = vld [vmem:[%s2248_s25 + $0xd8] sm:$0xff] }
  0x82   : > { %1712 = vmatpush3.bf16.msra.mxu1 %v1711_v38  ;;  %1682 = vmatprep.subr.bf16.mxu0 %v1681_v39  ;;  %v406_v57 = vld [vmem:[%s2248_s25 + $0x148] sm:$0xff]  ;;  %v423_v60 = vld [vmem:[%s2248_s25 + $0x1d0] sm:$0xff]  ;;  %v424_v61 = vld [vmem:[%s2248_s25 + $0x1d8] sm:$0xff]  ;;  %v1687_v62 = vpack.c.bf16 %v374_v54, %v373_v53  ;;  %v1689_v0 = vpack.c.bf16 %v392_v59, %v391_v58 }
  0x83   : > { %1714 = vmatprep.subr.bf16.mxu1 %v1713_v43  ;;  %v1719_v63 = vpack.c.bf16 %v406_v57, %v405_v55  ;;  %v375_v1 = vld [vmem:[%s2248_s25 + $0x50] sm:$0xff]  ;;  %v376_v2 = vld [vmem:[%s2248_s25 + $0x58] sm:$0xff]  ;;  %v1721_v4 = vpack.c.bf16 %v424_v61, %v423_v60  ;;  %v393_v6 = vld [vmem:[%s2248_s25 + $0xe0] sm:$0xff] }
  0x84   : > { %v407_v3 = vld [vmem:[%s2248_s25 + $0x150] sm:$0xff]  ;;  %v408_v5 = vld [vmem:[%s2248_s25 + $0x158] sm:$0xff]  ;;  %v394_v7 = vld [vmem:[%s2248_s25 + $0xe8] sm:$0xff]  ;;  %v1691_v10 = vpack.c.bf16 %v376_v2, %v375_v1 }
  0x85   : > { %1684 = vmatpush3.bf16.msra.mxu0 %v1683_v50  ;;  %v425_v8 = vld [vmem:[%s2248_s25 + $0x1e0] sm:$0xff]  ;;  %v426_v9 = vld [vmem:[%s2248_s25 + $0x1e8] sm:$0xff]  ;;  %v1723_v13 = vpack.c.bf16 %v408_v5, %v407_v3  ;;  %v1693_v14 = vpack.c.bf16 %v394_v7, %v393_v6  ;;  %v240_v17 = vld [vmem:[#allocation2 + $0x18] sm:$0xff] }
  0x86   : > { %1716 = vmatpush3.bf16.msra.mxu1 %v1715_v51  ;;  %1686 = vmatprep.subr.bf16.mxu0 %v1685_v52  ;;  %v377_v11 = vld [vmem:[%s2248_s25 + $0x60] sm:$0xff]  ;;  %v378_v12 = vld [vmem:[%s2248_s25 + $0x68] sm:$0xff]  ;;  %v1725_v18 = vpack.c.bf16 %v426_v9, %v425_v8  ;;  %v395_v20 = vld [vmem:[%s2248_s25 + $0xf0] sm:$0xff] }
  0x87   : > { %1718 = vmatprep.subr.bf16.mxu1 %v1717_v56  ;;  %v409_v15 = vld [vmem:[%s2248_s25 + $0x160] sm:$0xff]  ;;  %v238_v16 = vld [vmem:[#allocation2 + $0x8] sm:$0xff]  ;;  %v396_v21 = vld [vmem:[%s2248_s25 + $0xf8] sm:$0xff]  ;;  %702 = vmatprep.mubr.f32.mxu1 %v240_v17  ;;  %v1695_v24 = vpack.c.bf16 %v378_v12, %v377_v11 }
  0x88   : > { %v410_v19 = vld [vmem:[%s2248_s25 + $0x168] sm:$0xff]  ;;  %557 = vmatprep.mubr.f32.mxu0 %v238_v16  ;;  %v427_v22 = vld [vmem:[%s2248_s25 + $0x1f0] sm:$0xff]  ;;  %v428_v23 = vld [vmem:[%s2248_s25 + $0x1f8] sm:$0xff]  ;;  %v1697_v26 = vpack.c.bf16 %v396_v21, %v395_v20 }
  0x89   : > { %1688 = vmatpush3.bf16.msra.mxu0 %v1687_v62  ;;  %v1727_v25 = vpack.c.bf16 %v410_v19, %v409_v15  ;;  %v379_v27 = vld [vmem:[%s2248_s25 + $0x70] sm:$0xff]  ;;  %v380_v28 = vld [vmem:[%s2248_s25 + $0x78] sm:$0xff]  ;;  %v1729_v30 = vpack.c.bf16 %v428_v23, %v427_v22  ;;  %v445_v32 = vld [vmem:[%s2248_s25 + $0x280] sm:$0xff] }
  0x8a   : > { %1720 = vmatpush3.bf16.msra.mxu1 %v1719_v63  ;;  %1690 = vmatprep.subr.bf16.mxu0 %v1689_v0  ;;  %v411_v29 = vld [vmem:[%s2248_s25 + $0x170] sm:$0xff]  ;;  %v412_v31 = vld [vmem:[%s2248_s25 + $0x178] sm:$0xff]  ;;  %v446_v33 = vld [vmem:[%s2248_s25 + $0x288] sm:$0xff]  ;;  %v1699_v36 = vpack.c.bf16 %v380_v28, %v379_v27 }
  0x8b   : > { %1722 = vmatprep.subr.bf16.mxu1 %v1721_v4  ;;  %v477_v34 = vld [vmem:[%s2248_s25 + $0x380] sm:$0xff]  ;;  %v478_v35 = vld [vmem:[%s2248_s25 + $0x388] sm:$0xff]  ;;  %v1731_v37 = vpack.c.bf16 %v412_v31, %v411_v29  ;;  %v1733_v38 = vpack.c.bf16 %v446_v33, %v445_v32  ;;  %v447_v44 = vld [vmem:[%s2248_s25 + $0x290] sm:$0xff] }
  0x8c   : > { %v429_v39 = vld [vmem:[%s2248_s25 + $0x200] sm:$0xff]  ;;  %v430_v40 = vld [vmem:[%s2248_s25 + $0x208] sm:$0xff]  ;;  %v1765_v41 = vpack.c.bf16 %v478_v35, %v477_v34  ;;  %v448_v45 = vld [vmem:[%s2248_s25 + $0x298] sm:$0xff] }
  0x8d   : > { %1692 = vmatpush3.bf16.msra.mxu0 %v1691_v10  ;;  %v461_v42 = vld [vmem:[%s2248_s25 + $0x300] sm:$0xff]  ;;  %v462_v43 = vld [vmem:[%s2248_s25 + $0x308] sm:$0xff]  ;;  %v1735_v47 = vpack.c.bf16 %v430_v40, %v429_v39  ;;  %v479_v48 = vld [vmem:[%s2248_s25 + $0x390] sm:$0xff]  ;;  %v1737_v54 = vpack.c.bf16 %v448_v45, %v447_v44 }
  0x8e   : > { %1724 = vmatpush3.bf16.msra.mxu1 %v1723_v13  ;;  %1694 = vmatprep.subr.bf16.mxu0 %v1693_v14  ;;  %v237_v46 = vld [vmem:[#allocation2] sm:$0xff]  ;;  %v480_v49 = vld [vmem:[%s2248_s25 + $0x398] sm:$0xff]  ;;  %v239_v50 = vld [vmem:[#allocation2 + $0x10] sm:$0xff]  ;;  %v1767_v53 = vpack.c.bf16 %v462_v43, %v461_v42 }
  0x8f   : > { %1726 = vmatprep.subr.bf16.mxu1 %v1725_v18  ;;  %v246_v51 = vld [vmem:[#allocation2 + $0x48] sm:$0xff]  ;;  %v248_v52 = vld [vmem:[#allocation2 + $0x58] sm:$0xff]  ;;  %v431_v55 = vld [vmem:[%s2248_s25 + $0x210] sm:$0xff]  ;;  %v1769_v58 = vpack.c.bf16 %v480_v49, %v479_v48 }
  0x90   : > { %v432_v56 = vld [vmem:[%s2248_s25 + $0x218] sm:$0xff]  ;;  %v463_v57 = vld [vmem:[%s2248_s25 + $0x310] sm:$0xff]  ;;  %v449_v60 = vld [vmem:[%s2248_s25 + $0x2a0] sm:$0xff] }
  0x91   : > { %1696 = vmatpush3.bf16.msra.mxu0 %v1695_v24  ;;  %v464_v59 = vld [vmem:[%s2248_s25 + $0x318] sm:$0xff]  ;;  %v450_v61 = vld [vmem:[%s2248_s25 + $0x2a8] sm:$0xff]  ;;  %v245_v62 = vld [vmem:[#allocation2 + $0x40] sm:$0xff]  ;;  %v1739_v4 = vpack.c.bf16 %v432_v56, %v431_v55 }
  0x92   : > { %1728 = vmatpush3.bf16.msra.mxu1 %v1727_v25  ;;  %1698 = vmatprep.subr.bf16.mxu0 %v1697_v26  ;;  %v481_v63 = vld [vmem:[%s2248_s25 + $0x3a0] sm:$0xff]  ;;  %v482_v0 = vld [vmem:[%s2248_s25 + $0x3a8] sm:$0xff]  ;;  %v247_v1 = vld [vmem:[#allocation2 + $0x50] sm:$0xff]  ;;  %v1771_v5 = vpack.c.bf16 %v464_v59, %v463_v57  ;;  %v1741_v6 = vpack.c.bf16 %v450_v61, %v449_v60 }
  0x93   : > { %1730 = vmatprep.subr.bf16.mxu1 %v1729_v30  ;;  %v254_v2 = vld [vmem:[#allocation2 + $0x88] sm:$0xff]  ;;  %v256_v3 = vld [vmem:[#allocation2 + $0x98] sm:$0xff]  ;;  %v433_v7 = vld [vmem:[%s2248_s25 + $0x220] sm:$0xff]  ;;  %v1773_v10 = vpack.c.bf16 %v482_v0, %v481_v63 }
  0x94   : > { %v434_v8 = vld [vmem:[%s2248_s25 + $0x228] sm:$0xff]  ;;  %v465_v9 = vld [vmem:[%s2248_s25 + $0x320] sm:$0xff]  ;;  %v451_v12 = vld [vmem:[%s2248_s25 + $0x2b0] sm:$0xff] }
  0x95   : > { %1700 = vmatpush3.bf16.msra.mxu0 %v1699_v36  ;;  %v466_v11 = vld [vmem:[%s2248_s25 + $0x328] sm:$0xff]  ;;  %v452_v13 = vld [vmem:[%s2248_s25 + $0x2b8] sm:$0xff]  ;;  %v253_v14 = vld [vmem:[#allocation2 + $0x80] sm:$0xff]  ;;  %v1743_v19 = vpack.c.bf16 %v434_v8, %v433_v7 }
  0x96   : > { %1732 = vmatpush3.bf16.msra.mxu1 %v1731_v37  ;;  %1734 = vmatprep.subr.bf16.mxu0 %v1733_v38  ;;  %v483_v15 = vld [vmem:[%s2248_s25 + $0x3b0] sm:$0xff]  ;;  %v484_v16 = vld [vmem:[%s2248_s25 + $0x3b8] sm:$0xff]  ;;  %v262_v18 = vld [vmem:[#allocation2 + $0xc8] sm:$0xff]  ;;  %v1775_v21 = vpack.c.bf16 %v466_v11, %v465_v9  ;;  %v1745_v22 = vpack.c.bf16 %v452_v13, %v451_v12 }
  0x97   : > { %1766 = vmatprep.subr.bf16.mxu1 %v1765_v41  ;;  %v255_v17 = vld [vmem:[#allocation2 + $0x90] sm:$0xff]  ;;  %v264_v20 = vld [vmem:[#allocation2 + $0xd8] sm:$0xff]  ;;  %v261_v25 = vld [vmem:[#allocation2 + $0xc0] sm:$0xff]  ;;  %v1777_v26 = vpack.c.bf16 %v484_v16, %v483_v15 }
  0x98   : > { %558 = vmatmul.mubr.f32.vlgmr.msra.gmra.mrb[0].mxu0 %v237_v46  ;;  %v435_v23 = vld [vmem:[%s2248_s25 + $0x230] sm:$0xff]  ;;  %v436_v24 = vld [vmem:[%s2248_s25 + $0x238] sm:$0xff]  ;;  %v453_v30 = vld [vmem:[%s2248_s25 + $0x2c0] sm:$0xff] }
  0x99   : > { %703 = vmatmul.mubr.f32.vlgmr.msra.gmra.mrb[0].mxu1 %v239_v50  ;;  %1736 = vmatpush3.bf16.msra.mxu0 %v1735_v47  ;;  %v467_v27 = vld [vmem:[%s2248_s25 + $0x330] sm:$0xff]  ;;  %v468_v28 = vld [vmem:[%s2248_s25 + $0x338] sm:$0xff]  ;;  %v454_v31 = vld [vmem:[%s2248_s25 + $0x2c8] sm:$0xff]  ;;  %v1747_v33 = vpack.c.bf16 %v436_v24, %v435_v23 }
  0x9a   : > { %562 = vmatprep.mubr.f32.mxu0 %v246_v51  ;;  %707 = vmatprep.mubr.f32.mxu1 %v248_v52  ;;  %v263_v29 = vld [vmem:[#allocation2 + $0xd0] sm:$0xff]  ;;  %v270_v32 = vld [vmem:[#allocation2 + $0x108] sm:$0xff]  ;;  %v485_v34 = vld [vmem:[%s2248_s25 + $0x3c0] sm:$0xff]  ;;  %v1779_v37 = vpack.c.bf16 %v468_v28, %v467_v27  ;;  %v1749_v38 = vpack.c.bf16 %v454_v31, %v453_v30 }
  0x9b   : > { %1768 = vmatpush3.bf16.msra.mxu1 %v1767_v53  ;;  %1738 = vmatprep.subr.bf16.mxu0 %v1737_v54  ;;  %v486_v35 = vld [vmem:[%s2248_s25 + $0x3c8] sm:$0xff]  ;;  %v272_v36 = vld [vmem:[#allocation2 + $0x118] sm:$0xff]  ;;  %v437_v39 = vld [vmem:[%s2248_s25 + $0x240] sm:$0xff] }
  0x9c   : > { %563 = vmatmul.mubr.f32.gmra.mrb[2].mxu0 %v245_v62  ;;  %1770 = vmatprep.subr.bf16.mxu1 %v1769_v58  ;;  %v438_v40 = vld [vmem:[%s2248_s25 + $0x248] sm:$0xff]  ;;  %v1781_v41 = vpack.c.bf16 %v486_v35, %v485_v34  ;;  %v469_v42 = vld [vmem:[%s2248_s25 + $0x340] sm:$0xff]  ;;  %v271_v45 = vld [vmem:[#allocation2 + $0x110] sm:$0xff] }
  0x9d   : > { %708 = vmatmul.mubr.f32.gmra.mrb[2].mxu1 %v247_v1  ;;  %567 = vmatprep.mubr.f32.mxu0 %v254_v2  ;;  %v470_v43 = vld [vmem:[%s2248_s25 + $0x348] sm:$0xff]  ;;  %v269_v44 = vld [vmem:[#allocation2 + $0x100] sm:$0xff]  ;;  %v280_v47 = vld [vmem:[#allocation2 + $0x158] sm:$0xff]  ;;  %v1751_v48 = vpack.c.bf16 %v438_v40, %v437_v39 }
  0x9e   : > { %712 = vmatprep.mubr.f32.mxu1 %v256_v3  ;;  %1740 = vmatpush3.bf16.msra.mxu0 %v1739_v4  ;;  %v278_v46 = vld [vmem:[#allocation2 + $0x148] sm:$0xff]  ;;  %v455_v49 = vld [vmem:[%s2248_s25 + $0x2d0] sm:$0xff]  ;;  %v456_v50 = vld [vmem:[%s2248_s25 + $0x2d8] sm:$0xff]  ;;  %v1783_v51 = vpack.c.bf16 %v470_v43, %v469_v42 }
  0x9f   : > { %1772 = vmatpush3.bf16.msra.mxu1 %v1771_v5  ;;  %1742 = vmatprep.subr.bf16.mxu0 %v1741_v6  ;;  %v1753_v52 = vpack.c.bf16 %v456_v50, %v455_v49  ;;  %v439_v53 = vld [vmem:[%s2248_s25 + $0x250] sm:$0xff]  ;;  %v440_v54 = vld [vmem:[%s2248_s25 + $0x258] sm:$0xff]  ;;  %v277_v57 = vld [vmem:[#allocation2 + $0x140] sm:$0xff] }
  0xa0   : > { %568 = vmatmul.mubr.f32.gmra.mrb[4].mxu0 %v253_v14  ;;  %1774 = vmatprep.subr.bf16.mxu1 %v1773_v10  ;;  %v487_v55 = vld [vmem:[%s2248_s25 + $0x3d0] sm:$0xff]  ;;  %v488_v56 = vld [vmem:[%s2248_s25 + $0x3d8] sm:$0xff]  ;;  %v286_v62 = vld [vmem:[#allocation2 + $0x188] sm:$0xff]  ;;  %v1755_v63 = vpack.c.bf16 %v440_v54, %v439_v53 }
  0xa1   : > { %713 = vmatmul.mubr.f32.gmra.mrb[4].mxu1 %v255_v17  ;;  %572 = vmatprep.mubr.f32.mxu0 %v262_v18  ;;  %v1785_v58 = vpack.c.bf16 %v488_v56, %v487_v55  ;;  %v471_v59 = vld [vmem:[%s2248_s25 + $0x350] sm:$0xff]  ;;  %v472_v60 = vld [vmem:[%s2248_s25 + $0x358] sm:$0xff]  ;;  %v285_v1 = vld [vmem:[#allocation2 + $0x180] sm:$0xff] }
  0xa2   : > { %717 = vmatprep.mubr.f32.mxu1 %v264_v20  ;;  %1744 = vmatpush3.bf16.msra.mxu0 %v1743_v19  ;;  %v279_v61 = vld [vmem:[#allocation2 + $0x150] sm:$0xff]  ;;  %v288_v0 = vld [vmem:[#allocation2 + $0x198] sm:$0xff]  ;;  %v1787_v2 = vpack.c.bf16 %v472_v60, %v471_v59  ;;  %v457_v3 = vld [vmem:[%s2248_s25 + $0x2e0] sm:$0xff] }
  0xa3   : > { %1776 = vmatpush3.bf16.msra.mxu1 %v1775_v21  ;;  %1746 = vmatprep.subr.bf16.mxu0 %v1745_v22  ;;  %v458_v4 = vld [vmem:[%s2248_s25 + $0x2e8] sm:$0xff]  ;;  %v441_v5 = vld [vmem:[%s2248_s25 + $0x260] sm:$0xff]  ;;  %v287_v7 = vld [vmem:[#allocation2 + $0x190] sm:$0xff] }
  0xa4   : > { %573 = vmatmul.mubr.f32.gmra.mrb[6].mxu0 %v261_v25  ;;  %1778 = vmatprep.subr.bf16.mxu1 %v1777_v26  ;;  %v442_v6 = vld [vmem:[%s2248_s25 + $0x268] sm:$0xff]  ;;  %v1757_v8 = vpack.c.bf16 %v458_v4, %v457_v3  ;;  %v489_v9 = vld [vmem:[%s2248_s25 + $0x3e0] sm:$0xff]  ;;  %v296_v16 = vld [vmem:[#allocation2 + $0x1d8] sm:$0xff] }
  0xa5   : > { %718 = vmatmul.mubr.f32.gmra.mrb[6].mxu1 %v263_v29  ;;  %577 = vmatprep.mubr.f32.mxu0 %v270_v32  ;;  %v490_v10 = vld [vmem:[%s2248_s25 + $0x3e8] sm:$0xff]  ;;  %v1759_v12 = vpack.c.bf16 %v442_v6, %v441_v5  ;;  %v473_v14 = vld [vmem:[%s2248_s25 + $0x360] sm:$0xff]  ;;  %v295_v19 = vld [vmem:[#allocation2 + $0x1d0] sm:$0xff] }
  0xa6   : > { %722 = vmatprep.mubr.f32.mxu1 %v272_v36  ;;  %1748 = vmatpush3.bf16.msra.mxu0 %v1747_v33  ;;  %v294_v11 = vld [vmem:[#allocation2 + $0x1c8] sm:$0xff]  ;;  %v1789_v13 = vpack.c.bf16 %v490_v10, %v489_v9  ;;  %v293_v18 = vld [vmem:[#allocation2 + $0x1c0] sm:$0xff]  ;;  %v459_v21 = vld [vmem:[%s2248_s25 + $0x2f0] sm:$0xff] }
  0xa7   : > { %1780 = vmatpush3.bf16.msra.mxu1 %v1779_v37  ;;  %1750 = vmatprep.subr.bf16.mxu0 %v1749_v38  ;;  %v474_v15 = vld [vmem:[%s2248_s25 + $0x368] sm:$0xff]  ;;  %v460_v22 = vld [vmem:[%s2248_s25 + $0x2f8] sm:$0xff]  ;;  %v443_v23 = vld [vmem:[%s2248_s25 + $0x270] sm:$0xff] }
  0xa8   : > { %578 = vmatmul.mubr.f32.gmra.mrb[8].mxu0 %v269_v44  ;;  %1782 = vmatprep.subr.bf16.mxu1 %v1781_v41  ;;  %v1791_v17 = vpack.c.bf16 %v474_v15, %v473_v14  ;;  %v302_v20 = vld [vmem:[#allocation2 + $0x208] sm:$0xff]  ;;  %v1761_v24 = vpack.c.bf16 %v460_v22, %v459_v21  ;;  %v444_v25 = vld [vmem:[%s2248_s25 + $0x278] sm:$0xff]  ;;  %v491_v26 = vld [vmem:[%s2248_s25 + $0x3f0] sm:$0xff] }
  0xa9   : > { %723 = vmatmul.mubr.f32.gmra.mrb[8].mxu1 %v271_v45  ;;  %582 = vmatprep.mubr.f32.mxu0 %v278_v46  ;;  %v492_v27 = vld [vmem:[%s2248_s25 + $0x3f8] sm:$0xff]  ;;  %v1763_v29 = vpack.c.bf16 %v444_v25, %v443_v23  ;;  %v475_v31 = vld [vmem:[%s2248_s25 + $0x370] sm:$0xff]  ;;  %v301_v33 = vld [vmem:[#allocation2 + $0x200] sm:$0xff] }
  0xaa   : > { %727 = vmatprep.mubr.f32.mxu1 %v280_v47  ;;  %1752 = vmatpush3.bf16.msra.mxu0 %v1751_v48  ;;  %v304_v28 = vld [vmem:[#allocation2 + $0x218] sm:$0xff]  ;;  %v1793_v30 = vpack.c.bf16 %v492_v27, %v491_v26  ;;  %v303_v35 = vld [vmem:[#allocation2 + $0x210] sm:$0xff]  ;;  %v310_v36 = vld [vmem:[#allocation2 + $0x248] sm:$0xff] }
  0xab   : > { %1784 = vmatpush3.bf16.msra.mxu1 %v1783_v51  ;;  %1754 = vmatprep.subr.bf16.mxu0 %v1753_v52  ;;  %v476_v32 = vld [vmem:[%s2248_s25 + $0x378] sm:$0xff]  ;;  %v309_v38 = vld [vmem:[#allocation2 + $0x240] sm:$0xff]  ;;  %v311_v39 = vld [vmem:[#allocation2 + $0x250] sm:$0xff] }
  0xac   : > { %583 = vmatmul.mubr.f32.gmra.mrb[10].mxu0 %v277_v57  ;;  %1786 = vmatprep.subr.bf16.mxu1 %v1785_v58  ;;  %v1795_v34 = vpack.c.bf16 %v476_v32, %v475_v31  ;;  %v312_v37 = vld [vmem:[#allocation2 + $0x258] sm:$0xff]  ;;  %v318_v40 = vld [vmem:[#allocation2 + $0x288] sm:$0xff]  ;;  %v317_v42 = vld [vmem:[#allocation2 + $0x280] sm:$0xff] }
  0xad   : > { %728 = vmatmul.mubr.f32.gmra.mrb[10].mxu1 %v279_v61  ;;  %587 = vmatprep.mubr.f32.mxu0 %v286_v62  ;;  %v320_v41 = vld [vmem:[#allocation2 + $0x298] sm:$0xff]  ;;  %v319_v43 = vld [vmem:[#allocation2 + $0x290] sm:$0xff]  ;;  %v326_v44 = vld [vmem:[#allocation2 + $0x2c8] sm:$0xff] }
  0xae   : > { %732 = vmatprep.mubr.f32.mxu1 %v288_v0  ;;  %1756 = vmatpush3.bf16.msra.mxu0 %v1755_v63  ;;  %v328_v45 = vld [vmem:[#allocation2 + $0x2d8] sm:$0xff]  ;;  %v325_v46 = vld [vmem:[#allocation2 + $0x2c0] sm:$0xff]  ;;  %v327_v47 = vld [vmem:[#allocation2 + $0x2d0] sm:$0xff] }
  0xaf   : > { %1788 = vmatpush3.bf16.msra.mxu1 %v1787_v2  ;;  %1758 = vmatprep.subr.bf16.mxu0 %v1757_v8  ;;  %v334_v48 = vld [vmem:[#allocation2 + $0x308] sm:$0xff]  ;;  %v336_v49 = vld [vmem:[#allocation2 + $0x318] sm:$0xff]  ;;  %v333_v50 = vld [vmem:[#allocation2 + $0x300] sm:$0xff] }
  0xb0   : > { %588 = vmatmul.mubr.f32.gmra.mrb[12].mxu0 %v285_v1  ;;  %1790 = vmatprep.subr.bf16.mxu1 %v1789_v13  ;;  %v335_v51 = vld [vmem:[#allocation2 + $0x310] sm:$0xff]  ;;  %v342_v52 = vld [vmem:[#allocation2 + $0x348] sm:$0xff]  ;;  %v344_v53 = vld [vmem:[#allocation2 + $0x358] sm:$0xff] }
  0xb1   : > { %733 = vmatmul.mubr.f32.gmra.mrb[12].mxu1 %v287_v7  ;;  %592 = vmatprep.mubr.f32.mxu0 %v294_v11  ;;  %v341_v54 = vld [vmem:[#allocation2 + $0x340] sm:$0xff]  ;;  %v343_v55 = vld [vmem:[#allocation2 + $0x350] sm:$0xff]  ;;  %v350_v56 = vld [vmem:[#allocation2 + $0x388] sm:$0xff] }
  0xb2   : > { %737 = vmatprep.mubr.f32.mxu1 %v296_v16  ;;  %1760 = vmatpush3.bf16.msra.mxu0 %v1759_v12  ;;  %v352_v57 = vld [vmem:[#allocation2 + $0x398] sm:$0xff]  ;;  %v349_v58 = vld [vmem:[#allocation2 + $0x380] sm:$0xff]  ;;  %v351_v59 = vld [vmem:[#allocation2 + $0x390] sm:$0xff] }
  0xb3   : > { %1792 = vmatpush3.bf16.msra.mxu1 %v1791_v17  ;;  %1762 = vmatprep.subr.bf16.mxu0 %v1761_v24  ;;  %v358_v60 = vld [vmem:[#allocation2 + $0x3c8] sm:$0xff]  ;;  %v360_v61 = vld [vmem:[#allocation2 + $0x3d8] sm:$0xff]  ;;  %v357_v62 = vld [vmem:[#allocation2 + $0x3c0] sm:$0xff] }
  0xb4   : > { %593 = vmatmul.mubr.f32.gmra.mrb[14].mxu0 %v293_v18  ;;  %1794 = vmatprep.subr.bf16.mxu1 %v1793_v30  ;;  %v359_v63 = vld [vmem:[#allocation2 + $0x3d0] sm:$0xff]  ;;  %v242_v0 = vld [vmem:[#allocation2 + $0x28] sm:$0xff]  ;;  %v244_v1 = vld [vmem:[#allocation2 + $0x38] sm:$0xff] }
  0xb5   : > { %738 = vmatmul.mubr.f32.gmra.mrb[14].mxu1 %v295_v19  ;;  %597 = vmatprep.mubr.f32.mxu0 %v302_v20  ;;  %v241_v2 = vld [vmem:[#allocation2 + $0x20] sm:$0xff]  ;;  %v243_v3 = vld [vmem:[#allocation2 + $0x30] sm:$0xff]  ;;  %v250_v4 = vld [vmem:[#allocation2 + $0x68] sm:$0xff] }
  0xb6   : > { %742 = vmatprep.mubr.f32.mxu1 %v304_v28  ;;  %1764 = vmatpush3.bf16.msra.mxu0 %v1763_v29  ;;  %v252_v5 = vld [vmem:[#allocation2 + $0x78] sm:$0xff]  ;;  %v249_v6 = vld [vmem:[#allocation2 + $0x60] sm:$0xff]  ;;  %v251_v7 = vld [vmem:[#allocation2 + $0x70] sm:$0xff] }
  0xb7   : > { %1796 = vmatpush3.bf16.msra.mxu1 %v1795_v34  ;;  %v258_v8 = vld [vmem:[#allocation2 + $0xa8] sm:$0xff]  ;;  %v260_v9 = vld [vmem:[#allocation2 + $0xb8] sm:$0xff]  ;;  %v257_v10 = vld [vmem:[#allocation2 + $0xa0] sm:$0xff] }
  0xb8   : > { %598 = vmatmul.mubr.f32.gmra.mrb[16].mxu0 %v301_v33  ;;  %v259_v11 = vld [vmem:[#allocation2 + $0xb0] sm:$0xff]  ;;  %v266_v12 = vld [vmem:[#allocation2 + $0xe8] sm:$0xff]  ;;  %v268_v13 = vld [vmem:[#allocation2 + $0xf8] sm:$0xff] }
  0xb9   : > { %743 = vmatmul.mubr.f32.gmra.mrb[16].mxu1 %v303_v35  ;;  %602 = vmatprep.mubr.f32.mxu0 %v310_v36  ;;  %v265_v14 = vld [vmem:[#allocation2 + $0xe0] sm:$0xff]  ;;  %v267_v15 = vld [vmem:[#allocation2 + $0xf0] sm:$0xff]  ;;  %v274_v16 = vld [vmem:[#allocation2 + $0x128] sm:$0xff] }
  0xba   : > { %747 = vmatprep.mubr.f32.mxu1 %v312_v37  ;;  %v276_v17 = vld [vmem:[#allocation2 + $0x138] sm:$0xff]  ;;  %v273_v18 = vld [vmem:[#allocation2 + $0x120] sm:$0xff]  ;;  %v275_v19 = vld [vmem:[#allocation2 + $0x130] sm:$0xff] }
  0xbb   : > { %v282_v20 = vld [vmem:[#allocation2 + $0x168] sm:$0xff]  ;;  %v284_v21 = vld [vmem:[#allocation2 + $0x178] sm:$0xff]  ;;  %v281_v22 = vld [vmem:[#allocation2 + $0x160] sm:$0xff] }
  0xbc   : > { %603 = vmatmul.mubr.f32.gmra.mrb[18].mxu0 %v309_v38  ;;  %v283_v23 = vld [vmem:[#allocation2 + $0x170] sm:$0xff]  ;;  %v290_v24 = vld [vmem:[#allocation2 + $0x1a8] sm:$0xff]  ;;  %v292_v25 = vld [vmem:[#allocation2 + $0x1b8] sm:$0xff] }
  0xbd   : > { %748 = vmatmul.mubr.f32.gmra.mrb[18].mxu1 %v311_v39  ;;  %607 = vmatprep.mubr.f32.mxu0 %v318_v40  ;;  %v289_v26 = vld [vmem:[#allocation2 + $0x1a0] sm:$0xff]  ;;  %v291_v27 = vld [vmem:[#allocation2 + $0x1b0] sm:$0xff]  ;;  %v298_v28 = vld [vmem:[#allocation2 + $0x1e8] sm:$0xff] }
  0xbe   : > { %752 = vmatprep.mubr.f32.mxu1 %v320_v41  ;;  %v300_v29 = vld [vmem:[#allocation2 + $0x1f8] sm:$0xff]  ;;  %v297_v30 = vld [vmem:[#allocation2 + $0x1e0] sm:$0xff]  ;;  %v299_v31 = vld [vmem:[#allocation2 + $0x1f0] sm:$0xff] }
  0xbf   : > { %v306_v32 = vld [vmem:[#allocation2 + $0x228] sm:$0xff]  ;;  %v308_v33 = vld [vmem:[#allocation2 + $0x238] sm:$0xff]  ;;  %v305_v34 = vld [vmem:[#allocation2 + $0x220] sm:$0xff] }
  0xc0   : > { %608 = vmatmul.mubr.f32.gmra.mrb[20].mxu0 %v317_v42  ;;  %v307_v35 = vld [vmem:[#allocation2 + $0x230] sm:$0xff]  ;;  %v314_v36 = vld [vmem:[#allocation2 + $0x268] sm:$0xff]  ;;  %v316_v37 = vld [vmem:[#allocation2 + $0x278] sm:$0xff] }
  0xc1   : > { %753 = vmatmul.mubr.f32.gmra.mrb[20].mxu1 %v319_v43  ;;  %612 = vmatprep.mubr.f32.mxu0 %v326_v44  ;;  %v313_v38 = vld [vmem:[#allocation2 + $0x260] sm:$0xff]  ;;  %v315_v39 = vld [vmem:[#allocation2 + $0x270] sm:$0xff]  ;;  %v322_v40 = vld [vmem:[#allocation2 + $0x2a8] sm:$0xff] }
  0xc2   : > { %757 = vmatprep.mubr.f32.mxu1 %v328_v45  ;;  %v324_v41 = vld [vmem:[#allocation2 + $0x2b8] sm:$0xff]  ;;  %v321_v42 = vld [vmem:[#allocation2 + $0x2a0] sm:$0xff]  ;;  %v323_v43 = vld [vmem:[#allocation2 + $0x2b0] sm:$0xff] }
  0xc3   : > { %v330_v44 = vld [vmem:[#allocation2 + $0x2e8] sm:$0xff]  ;;  %v332_v45 = vld [vmem:[#allocation2 + $0x2f8] sm:$0xff] }
  0xc4   : > { %613 = vmatmul.mubr.f32.gmra.mrb[22].mxu0 %v325_v46  ;;  %v329_v46 = vld [vmem:[#allocation2 + $0x2e0] sm:$0xff] }
  0xc5   : > { %758 = vmatmul.mubr.f32.gmra.mrb[22].mxu1 %v327_v47  ;;  %617 = vmatprep.mubr.f32.mxu0 %v334_v48  ;;  %v331_v47 = vld [vmem:[#allocation2 + $0x2f0] sm:$0xff]  ;;  %v338_v48 = vld [vmem:[#allocation2 + $0x328] sm:$0xff] }
  0xc6   : > { %762 = vmatprep.mubr.f32.mxu1 %v336_v49  ;;  %v340_v49 = vld [vmem:[#allocation2 + $0x338] sm:$0xff] }
  0xc8   : > { %618 = vmatmul.mubr.f32.gmra.mrb[24].mxu0 %v333_v50  ;;  %v337_v50 = vld [vmem:[#allocation2 + $0x320] sm:$0xff] }
  0xc9   : > { %763 = vmatmul.mubr.f32.gmra.mrb[24].mxu1 %v335_v51  ;;  %622 = vmatprep.mubr.f32.mxu0 %v342_v52  ;;  %v339_v51 = vld [vmem:[#allocation2 + $0x330] sm:$0xff]  ;;  %v346_v52 = vld [vmem:[#allocation2 + $0x368] sm:$0xff] }
  0xca   : > { %767 = vmatprep.mubr.f32.mxu1 %v344_v53  ;;  %v348_v53 = vld [vmem:[#allocation2 + $0x378] sm:$0xff] }
  0xcc   : > { %623 = vmatmul.mubr.f32.gmra.mrb[26].mxu0 %v341_v54  ;;  %v345_v54 = vld [vmem:[#allocation2 + $0x360] sm:$0xff] }
  0xcd   : > { %768 = vmatmul.mubr.f32.gmra.mrb[26].mxu1 %v343_v55  ;;  %627 = vmatprep.mubr.f32.mxu0 %v350_v56  ;;  %v347_v55 = vld [vmem:[#allocation2 + $0x370] sm:$0xff]  ;;  %v354_v56 = vld [vmem:[#allocation2 + $0x3a8] sm:$0xff] }
  0xce   : > { %772 = vmatprep.mubr.f32.mxu1 %v352_v57  ;;  %v356_v57 = vld [vmem:[#allocation2 + $0x3b8] sm:$0xff] }
  0xd0   : > { %628 = vmatmul.mubr.f32.gmra.mrb[28].mxu0 %v349_v58  ;;  %v353_v58 = vld [vmem:[#allocation2 + $0x3a0] sm:$0xff] }
  0xd1   : > { %773 = vmatmul.mubr.f32.gmra.mrb[28].mxu1 %v351_v59  ;;  %632 = vmatprep.mubr.f32.mxu0 %v358_v60  ;;  %v355_v59 = vld [vmem:[#allocation2 + $0x3b0] sm:$0xff]  ;;  %v362_v60 = vld [vmem:[#allocation2 + $0x3e8] sm:$0xff] }
  0xd2   : > { %777 = vmatprep.mubr.f32.mxu1 %v360_v61  ;;  %v364_v61 = vld [vmem:[#allocation2 + $0x3f8] sm:$0xff] }
  0xd4   : > { %633 = vmatmul.mubr.f32.gmra.mrb[30].mxu0 %v357_v62  ;;  %v361_v62 = vld [vmem:[#allocation2 + $0x3e0] sm:$0xff] }
  0xd5   : > { %778 = vmatmul.mubr.f32.gmra.mrb[30].mxu1 %v359_v63  ;;  %847 = vmatprep.mubr.f32.mxu0 %v242_v0  ;;  %v363_v63 = vld [vmem:[#allocation2 + $0x3f0] sm:$0xff] }
  0xd6   : > { %992 = vmatprep.mubr.f32.mxu1 %v244_v1 }
  0xd8   : > { %848 = vmatmul.mubr.f32.vlgmr.msra.gmra.mrb[32].mxu0 %v241_v2 }
  0xd9   : > { %993 = vmatmul.mubr.f32.vlgmr.msra.gmra.mrb[32].mxu1 %v243_v3  ;;  %852 = vmatprep.mubr.f32.mxu0 %v250_v4 }
  0xda   : > { %997 = vmatprep.mubr.f32.mxu1 %v252_v5 }
  0xdc   : > { %853 = vmatmul.mubr.f32.gmra.mrb[34].mxu0 %v249_v6 }
  0xdd   : > { %998 = vmatmul.mubr.f32.gmra.mrb[34].mxu1 %v251_v7  ;;  %857 = vmatprep.mubr.f32.mxu0 %v258_v8 }
  0xde   : > { %1002 = vmatprep.mubr.f32.mxu1 %v260_v9 }
  0xe0   : > { %858 = vmatmul.mubr.f32.gmra.mrb[36].mxu0 %v257_v10 }
  0xe1   : > { %1003 = vmatmul.mubr.f32.gmra.mrb[36].mxu1 %v259_v11  ;;  %862 = vmatprep.mubr.f32.mxu0 %v266_v12 }
  0xe2   : > { %1007 = vmatprep.mubr.f32.mxu1 %v268_v13 }
  0xe4   : > { %863 = vmatmul.mubr.f32.gmra.mrb[38].mxu0 %v265_v14 }
  0xe5   : > { %1008 = vmatmul.mubr.f32.gmra.mrb[38].mxu1 %v267_v15  ;;  %867 = vmatprep.mubr.f32.mxu0 %v274_v16 }
  0xe6   : > { %1012 = vmatprep.mubr.f32.mxu1 %v276_v17 }
  0xe8   : > { %868 = vmatmul.mubr.f32.gmra.mrb[40].mxu0 %v273_v18 }
  0xe9   : > { %1013 = vmatmul.mubr.f32.gmra.mrb[40].mxu1 %v275_v19  ;;  %872 = vmatprep.mubr.f32.mxu0 %v282_v20 }
  0xea   : > { %1017 = vmatprep.mubr.f32.mxu1 %v284_v21 }
  0xec   : > { %873 = vmatmul.mubr.f32.gmra.mrb[42].mxu0 %v281_v22 }
  0xed   : > { %1018 = vmatmul.mubr.f32.gmra.mrb[42].mxu1 %v283_v23  ;;  %877 = vmatprep.mubr.f32.mxu0 %v290_v24 }
  0xee   : > { %1022 = vmatprep.mubr.f32.mxu1 %v292_v25 }
  0xf0   : > { %878 = vmatmul.mubr.f32.gmra.mrb[44].mxu0 %v289_v26 }
  0xf1   : > { %1023 = vmatmul.mubr.f32.gmra.mrb[44].mxu1 %v291_v27  ;;  %882 = vmatprep.mubr.f32.mxu0 %v298_v28 }
  0xf2   : > { %1027 = vmatprep.mubr.f32.mxu1 %v300_v29 }
  0xf4   : > { %883 = vmatmul.mubr.f32.gmra.mrb[46].mxu0 %v297_v30 }
  0xf5   : > { %1028 = vmatmul.mubr.f32.gmra.mrb[46].mxu1 %v299_v31  ;;  %887 = vmatprep.mubr.f32.mxu0 %v306_v32 }
  0xf6   : > { %1032 = vmatprep.mubr.f32.mxu1 %v308_v33 }
  0xf8   : > { %888 = vmatmul.mubr.f32.gmra.mrb[48].mxu0 %v305_v34 }
  0xf9   : > { %1033 = vmatmul.mubr.f32.gmra.mrb[48].mxu1 %v307_v35  ;;  %892 = vmatprep.mubr.f32.mxu0 %v314_v36 }
  0xfa   : > { %1037 = vmatprep.mubr.f32.mxu1 %v316_v37 }
  0xfc   : > { %893 = vmatmul.mubr.f32.gmra.mrb[50].mxu0 %v313_v38 }
  0xfd   : > { %1038 = vmatmul.mubr.f32.gmra.mrb[50].mxu1 %v315_v39  ;;  %897 = vmatprep.mubr.f32.mxu0 %v322_v40 }
  0xfe   : > { %1042 = vmatprep.mubr.f32.mxu1 %v324_v41 }
 0x100   : > { %898 = vmatmul.mubr.f32.gmra.mrb[52].mxu0 %v321_v42 }
 0x101   : > { %1043 = vmatmul.mubr.f32.gmra.mrb[52].mxu1 %v323_v43  ;;  %902 = vmatprep.mubr.f32.mxu0 %v330_v44 }
 0x102   : > { %1047 = vmatprep.mubr.f32.mxu1 %v332_v45 }
 0x104   : > { %903 = vmatmul.mubr.f32.gmra.mrb[54].mxu0 %v329_v46 }
 0x105   : > { %1048 = vmatmul.mubr.f32.gmra.mrb[54].mxu1 %v331_v47  ;;  %907 = vmatprep.mubr.f32.mxu0 %v338_v48 }
 0x106   : > { %1052 = vmatprep.mubr.f32.mxu1 %v340_v49 }
 0x108   : > { %908 = vmatmul.mubr.f32.gmra.mrb[56].mxu0 %v337_v50 }
 0x109   : > { %1053 = vmatmul.mubr.f32.gmra.mrb[56].mxu1 %v339_v51  ;;  %912 = vmatprep.mubr.f32.mxu0 %v346_v52 }
 0x10a   : > { %1057 = vmatprep.mubr.f32.mxu1 %v348_v53 }
 0x10c   : > { %913 = vmatmul.mubr.f32.gmra.mrb[58].mxu0 %v345_v54 }
 0x10d   : > { %1058 = vmatmul.mubr.f32.gmra.mrb[58].mxu1 %v347_v55  ;;  %917 = vmatprep.mubr.f32.mxu0 %v354_v56 }
 0x10e   : > { %1062 = vmatprep.mubr.f32.mxu1 %v356_v57 }
 0x110   : > { %918 = vmatmul.mubr.f32.gmra.mrb[60].mxu0 %v353_v58 }
 0x111   : > { %1063 = vmatmul.mubr.f32.gmra.mrb[60].mxu1 %v355_v59  ;;  %922 = vmatprep.mubr.f32.mxu0 %v362_v60 }
 0x112   : > { %1067 = vmatprep.mubr.f32.mxu1 %v364_v61 }
 0x114   : > { %923 = vmatmul.mubr.f32.gmra.mrb[62].mxu0 %v361_v62 }
 0x115   : > { %1068 = vmatmul.mubr.f32.gmra.mrb[62].mxu1 %v363_v63 }
 0x16b   : > { %v1381_v0 = vpop.f32.mrb[0].mxu0 }
 0x16c   : > { %v1461_v1 = vpop.f32.mrb[0].mxu1  ;;  %v1382_v2 = vpop.f32.mrb[1].mxu0 }
 0x16d   : > { %v1383_v3 = vadd.f32 %v1382_v2, %v1381_v0  ;;  %v1462_v4 = vpop.f32.mrb[1].mxu1 }
 0x16e   : > { %v1463_v5 = vadd.f32 %v1462_v4, %v1461_v1 }
 0x16f   : > { %v1384_v6 = vpop.f32.mrb[2].mxu0 }
 0x170   : > { %v2382_v7 = vadd.f32 %v1463_v5, %v1383_v3  ;;  %v1464_v8 = vpop.f32.mrb[2].mxu1  ;;  %v1385_v9 = vpop.f32.mrb[3].mxu0 }
 0x171   : > { %v1386_v10 = vadd.f32 %v1385_v9, %v1384_v6  ;;  %v1465_v11 = vpop.f32.mrb[3].mxu1 }
 0x172   : > { %v1466_v12 = vadd.f32 %v1465_v11, %v1464_v8 }
 0x173   : > { %v1387_v13 = vpop.f32.mrb[4].mxu0 }
 0x174   : > { %v2384_v14 = vadd.f32 %v1466_v12, %v1386_v10  ;;  %v1467_v15 = vpop.f32.mrb[4].mxu1  ;;  %v1388_v16 = vpop.f32.mrb[5].mxu0 }
 0x175   : > { %v1389_v17 = vadd.f32 %v1388_v16, %v1387_v13  ;;  %v1468_v18 = vpop.f32.mrb[5].mxu1 }
 0x176   : > { %v1469_v19 = vadd.f32 %v1468_v18, %v1467_v15 }
 0x177   : > { %v1390_v20 = vpop.f32.mrb[6].mxu0 }
 0x178   : > { %v2386_v21 = vadd.f32 %v1469_v19, %v1389_v17  ;;  %v1470_v22 = vpop.f32.mrb[6].mxu1  ;;  %v1391_v23 = vpop.f32.mrb[7].mxu0 }
 0x179   : > { %v1392_v24 = vadd.f32 %v1391_v23, %v1390_v20  ;;  %v1471_v25 = vpop.f32.mrb[7].mxu1 }
 0x17a   : > { %v1472_v26 = vadd.f32 %v1471_v25, %v1470_v22 }
 0x17b   : > { %v1393_v27 = vpop.f32.mrb[8].mxu0 }
 0x17c   : > { %v2388_v28 = vadd.f32 %v1472_v26, %v1392_v24  ;;  %v1473_v29 = vpop.f32.mrb[8].mxu1  ;;  %v1394_v30 = vpop.f32.mrb[9].mxu0 }
 0x17d   : > { %v1395_v31 = vadd.f32 %v1394_v30, %v1393_v27  ;;  %v1474_v32 = vpop.f32.mrb[9].mxu1 }
 0x17e   : > { %v1475_v33 = vadd.f32 %v1474_v32, %v1473_v29 }
 0x17f   : > { %v1396_v34 = vpop.f32.mrb[10].mxu0 }
 0x180   : > { %v2390_v35 = vadd.f32 %v1475_v33, %v1395_v31  ;;  %v1476_v36 = vpop.f32.mrb[10].mxu1  ;;  %v1397_v37 = vpop.f32.mrb[11].mxu0 }
 0x181   : > { %v1398_v38 = vadd.f32 %v1397_v37, %v1396_v34  ;;  %v1477_v39 = vpop.f32.mrb[11].mxu1 }
 0x182   : > { %v1478_v40 = vadd.f32 %v1477_v39, %v1476_v36 }
 0x183   : > { %v1399_v41 = vpop.f32.mrb[12].mxu0 }
 0x184   : > { %v2392_v42 = vadd.f32 %v1478_v40, %v1398_v38  ;;  %v1479_v43 = vpop.f32.mrb[12].mxu1  ;;  %v1400_v44 = vpop.f32.mrb[13].mxu0 }
 0x185   : > { %v1401_v45 = vadd.f32 %v1400_v44, %v1399_v41  ;;  %v1480_v46 = vpop.f32.mrb[13].mxu1 }
 0x186   : > { %v1481_v47 = vadd.f32 %v1480_v46, %v1479_v43 }
 0x187   : > { %v1402_v48 = vpop.f32.mrb[14].mxu0 }
 0x188   : > { %v2394_v49 = vadd.f32 %v1481_v47, %v1401_v45  ;;  %v1482_v50 = vpop.f32.mrb[14].mxu1  ;;  %v1403_v51 = vpop.f32.mrb[15].mxu0 }
 0x189   : > { %v1404_v52 = vadd.f32 %v1403_v51, %v1402_v48  ;;  %v1483_v53 = vpop.f32.mrb[15].mxu1 }
 0x18a   : > { %v1484_v54 = vadd.f32 %v1483_v53, %v1482_v50 }
 0x18b   : > { %v1405_v55 = vpop.f32.mrb[16].mxu0 }
 0x18c   : > { %v2396_v56 = vadd.f32 %v1484_v54, %v1404_v52  ;;  %v1485_v57 = vpop.f32.mrb[16].mxu1  ;;  %v1406_v58 = vpop.f32.mrb[17].mxu0 }
 0x18d   : > { %v1407_v59 = vadd.f32 %v1406_v58, %v1405_v55  ;;  %v1486_v60 = vpop.f32.mrb[17].mxu1 }
 0x18e   : > { %v1487_v61 = vadd.f32 %v1486_v60, %v1485_v57 }
 0x18f   : > { %v1408_v62 = vpop.f32.mrb[18].mxu0 }
 0x190   : > { %v2398_v63 = vadd.f32 %v1487_v61, %v1407_v59  ;;  %v1488_v0 = vpop.f32.mrb[18].mxu1  ;;  %v1409_v1 = vpop.f32.mrb[19].mxu0 }
 0x191   : > { %v1410_v2 = vadd.f32 %v1409_v1, %v1408_v62  ;;  %v1489_v3 = vpop.f32.mrb[19].mxu1 }
 0x192   : > { %v1490_v4 = vadd.f32 %v1489_v3, %v1488_v0 }
 0x193   : > { %v1411_v5 = vpop.f32.mrb[20].mxu0 }
 0x194   : > { %v2400_v6 = vadd.f32 %v1490_v4, %v1410_v2  ;;  %v1491_v8 = vpop.f32.mrb[20].mxu1  ;;  %v1412_v9 = vpop.f32.mrb[21].mxu0 }
 0x195   : > { %v1413_v10 = vadd.f32 %v1412_v9, %v1411_v5  ;;  %v1492_v11 = vpop.f32.mrb[21].mxu1 }
 0x196   : > { %v1493_v12 = vadd.f32 %v1492_v11, %v1491_v8 }
 0x197   : > { %v1414_v13 = vpop.f32.mrb[22].mxu0 }
 0x198   : > { %v2402_v15 = vadd.f32 %v1493_v12, %v1413_v10  ;;  %v1494_v16 = vpop.f32.mrb[22].mxu1  ;;  %v1415_v17 = vpop.f32.mrb[23].mxu0 }
 0x199   : > { %v1416_v18 = vadd.f32 %v1415_v17, %v1414_v13  ;;  %v1495_v19 = vpop.f32.mrb[23].mxu1 }
 0x19a   : > { %v1496_v20 = vadd.f32 %v1495_v19, %v1494_v16 }
 0x19b   : > { %v1417_v22 = vpop.f32.mrb[24].mxu0 }
 0x19c   : > { %v2404_v23 = vadd.f32 %v1496_v20, %v1416_v18  ;;  %v1497_v24 = vpop.f32.mrb[24].mxu1  ;;  %v1418_v25 = vpop.f32.mrb[25].mxu0 }
 0x19d   : > { %v1419_v26 = vadd.f32 %v1418_v25, %v1417_v22  ;;  %v1498_v27 = vpop.f32.mrb[25].mxu1 }
 0x19e   : > { %v1499_v29 = vadd.f32 %v1498_v27, %v1497_v24 }
 0x19f   : > { %v1420_v30 = vpop.f32.mrb[26].mxu0 }
 0x1a0   : > { %v2406_v31 = vadd.f32 %v1499_v29, %v1419_v26  ;;  %v1500_v32 = vpop.f32.mrb[26].mxu1  ;;  %v1421_v33 = vpop.f32.mrb[27].mxu0 }
 0x1a1   : > { %v1422_v34 = vadd.f32 %v1421_v33, %v1420_v30  ;;  %v1501_v36 = vpop.f32.mrb[27].mxu1 }
 0x1a2   : > { %v1502_v37 = vadd.f32 %v1501_v36, %v1500_v32 }
 0x1a3   : > { %v1423_v38 = vpop.f32.mrb[28].mxu0 }
 0x1a4   : > { %v2408_v39 = vadd.f32 %v1502_v37, %v1422_v34  ;;  %v1503_v40 = vpop.f32.mrb[28].mxu1  ;;  %v1424_v41 = vpop.f32.mrb[29].mxu0 }
 0x1a5   : > { %v1425_v43 = vadd.f32 %v1424_v41, %v1423_v38  ;;  %v1504_v44 = vpop.f32.mrb[29].mxu1 }
 0x1a6   : > { %v1505_v45 = vadd.f32 %v1504_v44, %v1503_v40 }
 0x1a7   : > { %v1426_v46 = vpop.f32.mrb[30].mxu0 }
 0x1a8   : > { %v2410_v47 = vadd.f32 %v1505_v45, %v1425_v43  ;;  %v1506_v48 = vpop.f32.mrb[30].mxu1  ;;  %v1427_v50 = vpop.f32.mrb[31].mxu0 }
 0x1a9   : > { %v1428_v51 = vadd.f32 %v1427_v50, %v1426_v46  ;;  %v1507_v52 = vpop.f32.mrb[31].mxu1 }
 0x1aa   : > { %v1508_v53 = vadd.f32 %v1507_v52, %v1506_v48 }
 0x1ab   : > { %v1541_v54 = vpop.f32.mrb[32].mxu0 }
 0x1ac   : > { %v2412_v55 = vadd.f32 %v1508_v53, %v1428_v51  ;;  %v1542_v57 = vpop.f32.mrb[33].mxu0  ;;  %v1621_v58 = vpop.f32.mrb[32].mxu1 }
 0x1ad   : > { %v1543_v59 = vadd.f32 %v1542_v57, %v1541_v54  ;;  %v1622_v60 = vpop.f32.mrb[33].mxu1 }
 0x1ae   : > { %v1623_v61 = vadd.f32 %v1622_v60, %v1621_v58 }
 0x1af   : > { %v850_v62 = vadd.f32 %v1543_v59, %v2382_v7  ;;  %v1544_v0 = vpop.f32.mrb[34].mxu0 }
 0x1b0   : > { %v1545_v1 = vpop.f32.mrb[35].mxu0  ;;  %v1624_v2 = vpop.f32.mrb[34].mxu1 }
 0x1b1   : > { %v2415_v3 = vadd.f32 %v1623_v61, %v850_v62  ;;  %v1546_v4 = vadd.f32 %v1545_v1, %v1544_v0  ;;  %v1625_v5 = vpop.f32.mrb[35].mxu1 }
 0x1b2   : > { %v1626_v8 = vadd.f32 %v1625_v5, %v1624_v2 }
 0x1b3   : > { %v855_v9 = vadd.f32 %v1546_v4, %v2384_v14  ;;  %v1547_v10 = vpop.f32.mrb[36].mxu0 }
 0x1b4   : > { %v1548_v11 = vpop.f32.mrb[37].mxu0  ;;  %v1627_v12 = vpop.f32.mrb[36].mxu1 }
 0x1b5   : > { %v2418_v13 = vadd.f32 %v1626_v8, %v855_v9  ;;  %v1549_v16 = vadd.f32 %v1548_v11, %v1547_v10  ;;  %v1628_v17 = vpop.f32.mrb[37].mxu1 }
 0x1b6   : > { %v1629_v18 = vadd.f32 %v1628_v17, %v1627_v12 }
 0x1b7   : > { %v1074_v7 = vadd.f32 %v2418_v13, %v2415_v3  ;;  %v860_v19 = vadd.f32 %v1549_v16, %v2386_v21  ;;  %v1550_v20 = vpop.f32.mrb[38].mxu0 }
 0x1b8   : > { %v1551_v22 = vpop.f32.mrb[39].mxu0  ;;  %v1630_v24 = vpop.f32.mrb[38].mxu1 }
 0x1b9   : > { %v2423_v25 = vadd.f32 %v1629_v18, %v860_v19  ;;  %v1552_v26 = vadd.f32 %v1551_v22, %v1550_v20  ;;  %v1631_v14 = vpop.f32.mrb[39].mxu1 }
 0x1ba   : > { %v1632_v27 = vadd.f32 %v1631_v14, %v1630_v24 }
 0x1bb   : > { %v1075_v29 = vadd.f32 %v1074_v7, %v2423_v25  ;;  %v865_v30 = vadd.f32 %v1552_v26, %v2388_v28  ;;  %v1553_v32 = vpop.f32.mrb[40].mxu0 }
 0x1bc   : > { %v1554_v33 = vpop.f32.mrb[41].mxu0  ;;  %v1633_v34 = vpop.f32.mrb[40].mxu1 }
 0x1bd   : > { %v2427_v36 = vadd.f32 %v1632_v27, %v865_v30  ;;  %v1555_v37 = vadd.f32 %v1554_v33, %v1553_v32  ;;  %v1634_v38 = vpop.f32.mrb[41].mxu1 }
 0x1be   : > { %v1635_v21 = vadd.f32 %v1634_v38, %v1633_v34 }
 0x1bf   : > { %v1076_v40 = vadd.f32 %v1075_v29, %v2427_v36  ;;  %v870_v41 = vadd.f32 %v1555_v37, %v2390_v35  ;;  %v1556_v43 = vpop.f32.mrb[42].mxu0 }
 0x1c0   : > { %v1557_v44 = vpop.f32.mrb[43].mxu0  ;;  %v1636_v45 = vpop.f32.mrb[42].mxu1 }
 0x1c1   : > { %v2431_v46 = vadd.f32 %v1635_v21, %v870_v41  ;;  %v1558_v48 = vadd.f32 %v1557_v44, %v1556_v43  ;;  %v1637_v50 = vpop.f32.mrb[43].mxu1 }
 0x1c2   : > { %v1638_v28 = vadd.f32 %v1637_v50, %v1636_v45 }
 0x1c3   : > { %v1077_v51 = vadd.f32 %v1076_v40, %v2431_v46  ;;  %v875_v52 = vadd.f32 %v1558_v48, %v2392_v42  ;;  %v1559_v53 = vpop.f32.mrb[44].mxu0 }
 0x1c4   : > { %v1560_v54 = vpop.f32.mrb[45].mxu0  ;;  %v1639_v57 = vpop.f32.mrb[44].mxu1 }
 0x1c5   : > { %v2435_v58 = vadd.f32 %v1638_v28, %v875_v52  ;;  %v1561_v59 = vadd.f32 %v1560_v54, %v1559_v53  ;;  %v1640_v60 = vpop.f32.mrb[45].mxu1 }
 0x1c6   : > { %v1641_v35 = vadd.f32 %v1640_v60, %v1639_v57 }
 0x1c7   : > { %v1078_v61 = vadd.f32 %v1077_v51, %v2435_v58  ;;  %v880_v62 = vadd.f32 %v1561_v59, %v2394_v49  ;;  %v1562_v0 = vpop.f32.mrb[46].mxu0 }
 0x1c8   : > { %v1563_v1 = vpop.f32.mrb[47].mxu0  ;;  %v1642_v2 = vpop.f32.mrb[46].mxu1 }
 0x1c9   : > { %v2439_v4 = vadd.f32 %v1641_v35, %v880_v62  ;;  %v1564_v5 = vadd.f32 %v1563_v1, %v1562_v0  ;;  %v1643_v8 = vpop.f32.mrb[47].mxu1 }
 0x1ca   : > { %v1644_v42 = vadd.f32 %v1643_v8, %v1642_v2 }
 0x1cb   : > { %v1079_v9 = vadd.f32 %v1078_v61, %v2439_v4  ;;  %v885_v10 = vadd.f32 %v1564_v5, %v2396_v56  ;;  %v1565_v11 = vpop.f32.mrb[48].mxu0 }
 0x1cc   : > { %v1566_v12 = vpop.f32.mrb[49].mxu0  ;;  %v1645_v16 = vpop.f32.mrb[48].mxu1 }
 0x1cd   : > { %v2443_v17 = vadd.f32 %v1644_v42, %v885_v10  ;;  %v1567_v18 = vadd.f32 %v1566_v12, %v1565_v11  ;;  %v1646_v7 = vpop.f32.mrb[49].mxu1 }
 0x1ce   : > { %v1647_v49 = vadd.f32 %v1646_v7, %v1645_v16 }
 0x1cf   : > { %v1080_v19 = vadd.f32 %v1079_v9, %v2443_v17  ;;  %v890_v20 = vadd.f32 %v1567_v18, %v2398_v63  ;;  %v1568_v22 = vpop.f32.mrb[50].mxu0 }
 0x1d0   : > { %v1569_v24 = vpop.f32.mrb[51].mxu0  ;;  %v1648_v26 = vpop.f32.mrb[50].mxu1 }
 0x1d1   : > { %v2447_v14 = vadd.f32 %v1647_v49, %v890_v20  ;;  %v1570_v27 = vadd.f32 %v1569_v24, %v1568_v22  ;;  %v1649_v29 = vpop.f32.mrb[51].mxu1 }
 0x1d2   : > { %v1650_v56 = vadd.f32 %v1649_v29, %v1648_v26 }
 0x1d3   : > { %v1081_v30 = vadd.f32 %v1080_v19, %v2447_v14  ;;  %v895_v32 = vadd.f32 %v1570_v27, %v2400_v6  ;;  %v1571_v33 = vpop.f32.mrb[52].mxu0 }
 0x1d4   : > { %v1572_v34 = vpop.f32.mrb[53].mxu0  ;;  %v1651_v37 = vpop.f32.mrb[52].mxu1 }
 0x1d5   : > { %v2451_v38 = vadd.f32 %v1650_v56, %v895_v32  ;;  %v1573_v21 = vadd.f32 %v1572_v34, %v1571_v33  ;;  %v1652_v40 = vpop.f32.mrb[53].mxu1 }
 0x1d6   : > { %v1653_v63 = vadd.f32 %v1652_v40, %v1651_v37 }
 0x1d7   : > { %v1082_v41 = vadd.f32 %v1081_v30, %v2451_v38  ;;  %v900_v43 = vadd.f32 %v1573_v21, %v2402_v15  ;;  %v1574_v44 = vpop.f32.mrb[54].mxu0 }
 0x1d8   : > { %v1575_v45 = vpop.f32.mrb[55].mxu0  ;;  %v1654_v48 = vpop.f32.mrb[54].mxu1 }
 0x1d9   : > { %v1045_v50 = vadd.f32 %v1653_v63, %v900_v43  ;;  %v1576_v28 = vadd.f32 %v1575_v45, %v1574_v44  ;;  %v1655_v51 = vpop.f32.mrb[55].mxu1 }
 0x1da   : > { %v1656_v52 = vadd.f32 %v1655_v51, %v1654_v48 }
 0x1db   : > { %v1083_v6 = vadd.f32 %v1082_v41, %v1045_v50  ;;  %v905_v53 = vadd.f32 %v1576_v28, %v2404_v23  ;;  %v1577_v54 = vpop.f32.mrb[56].mxu0 }
 0x1dc   : > { %v1578_v57 = vpop.f32.mrb[57].mxu0  ;;  %v1657_v59 = vpop.f32.mrb[56].mxu1 }
 0x1dd   : > { %v1050_v60 = vadd.f32 %v1656_v52, %v905_v53  ;;  %v1579_v35 = vadd.f32 %v1578_v57, %v1577_v54  ;;  %v1658_v61 = vpop.f32.mrb[57].mxu1 }
 0x1de   : > { %v1659_v62 = vadd.f32 %v1658_v61, %v1657_v59 }
 0x1df   : > { %v1084_v0 = vadd.f32 %v1083_v6, %v1050_v60  ;;  %v910_v15 = vadd.f32 %v1579_v35, %v2406_v31  ;;  %v1580_v1 = vpop.f32.mrb[58].mxu0 }
 0x1e0   : > { %v1581_v2 = vpop.f32.mrb[59].mxu0  ;;  %v1660_v5 = vpop.f32.mrb[58].mxu1 }
 0x1e1   : > { %v1055_v8 = vadd.f32 %v1659_v62, %v910_v15  ;;  %v1582_v42 = vadd.f32 %v1581_v2, %v1580_v1  ;;  %v1661_v9 = vpop.f32.mrb[59].mxu1 }
 0x1e2   : > { %v1662_v10 = vadd.f32 %v1661_v9, %v1660_v5 }
 0x1e3   : > { %v1085_v11 = vadd.f32 %v1084_v0, %v1055_v8  ;;  %v915_v23 = vadd.f32 %v1582_v42, %v2408_v39  ;;  %v1583_v12 = vpop.f32.mrb[60].mxu0 }
 0x1e4   : > { %v1584_v16 = vpop.f32.mrb[61].mxu0  ;;  %v1663_v18 = vpop.f32.mrb[60].mxu1 }
 0x1e5   : > { %v1060_v7 = vadd.f32 %v1662_v10, %v915_v23  ;;  %v1585_v49 = vadd.f32 %v1584_v16, %v1583_v12  ;;  %v1664_v19 = vpop.f32.mrb[61].mxu1 }
 0x1e6   : > { %v1665_v20 = vadd.f32 %v1664_v19, %v1663_v18 }
 0x1e7   : > { %v1086_v22 = vadd.f32 %v1085_v11, %v1060_v7  ;;  %v920_v31 = vadd.f32 %v1585_v49, %v2410_v47  ;;  %v1586_v24 = vpop.f32.mrb[62].mxu0 }
 0x1e8   : > { %v1587_v26 = vpop.f32.mrb[63].mxu0  ;;  %v1666_v27 = vpop.f32.mrb[62].mxu1 }
 0x1e9   : > { %v1065_v29 = vadd.f32 %v1665_v20, %v920_v31  ;;  %v1588_v56 = vadd.f32 %v1587_v26, %v1586_v24  ;;  %v1667_v30 = vpop.f32.mrb[63].mxu1 }
 0x1ea   : > { %v1668_v32 = vadd.f32 %v1667_v30, %v1666_v27 }
 0x1eb   : > { %v1087_v33 = vadd.f32 %v1086_v22, %v1065_v29  ;;  %v925_v39 = vadd.f32 %v1588_v56, %v2412_v55 }
 0x1ed   : > { %v1070_v34 = vadd.f32 %v1668_v32, %v925_v39 }
 0x1ef   : > { %v1088_v37 = vadd.f32 %v1087_v33, %v1070_v34  ;;  %v1073_v33 = vld [vmem:[%s209_s27] sm:$0x7] }
 0x1f1   : > { %v1089_v21 = vrot.slane %v1088_v37, 4 }
 0x1f3   : > { %v1090_v40 = vadd.f32 %v1089_v21, %v1088_v37  ;;  %v1158_v21 = vlaneseq }
 0x1f5   : > { %v1091_v63 = vrot.slane %v1090_v40, 2 }
 0x1f7   : > { %v1092_v41 = vadd.f32 %v1091_v63, %v1090_v40  ;;  %v1159_v40 = vshrl.u32 %v1158_v21, 7 }
 0x1f9   : > { %v1093_v43 = vrot.slane %v1092_v41, 1 }
 0x1fb   : > { %v1094_v44 = vadd.f32 %v1093_v43, %v1092_v41  ;;  %v1160_v43 = vsub.s32 0, %v1159_v40 }
 0x1fd   : > { %v1096_v45 = vmul.f32 0.0078125, %v1094_v44  ;;  %v1180_v44 = vsub.s32 2, %v1159_v40 }
 0x1ff   : > { %v2461_v47 = vsub.f32 %v2415_v3, %v1096_v45  ;;  %v2464_v48 = vsub.f32 %v2418_v13, %v1096_v45  ;;  %v2467_v28 = vsub.f32 %v2423_v25, %v1096_v45  ;;  %v2470_v55 = vsub.f32 %v2427_v36, %v1096_v45 }
 0x200   : > { %v2473_v51 = vsub.f32 %v2431_v46, %v1096_v45  ;;  %v2476_v52 = vsub.f32 %v2435_v58, %v1096_v45  ;;  %v2479_v6 = vsub.f32 %v2439_v4, %v1096_v45  ;;  %v2482_v3 = vsub.f32 %v2443_v17, %v1096_v45 }
 0x201   : > { %v2485_v13 = vsub.f32 %v2447_v14, %v1096_v45  ;;  %v2488_v25 = vsub.f32 %v2451_v38, %v1096_v45  ;;  %v2490_v36 = vsub.f32 %v1045_v50, %v1096_v45  ;;  %v2492_v53 = vsub.f32 %v1050_v60, %v1096_v45 }
 0x202   : > { %v2494_v46 = vsub.f32 %v1055_v8, %v1096_v45  ;;  %v2496_v58 = vsub.f32 %v1060_v7, %v1096_v45  ;;  %v2498_v54 = vsub.f32 %v1065_v29, %v1096_v45  ;;  %v2500_v4 = vsub.f32 %v1070_v34, %v1096_v45 }
 0x203   : > { %v1113_v17 = vmul.f32 %v2461_v47, %v2461_v47  ;;  %v1114_v14 = vmul.f32 %v2464_v48, %v2464_v48  ;;  %v1115_v38 = vmul.f32 %v2467_v28, %v2467_v28  ;;  %v1116_v57 = vmul.f32 %v2470_v55, %v2470_v55 }
 0x204   : > { %v1117_v60 = vmul.f32 %v2473_v51, %v2473_v51  ;;  %v1118_v61 = vmul.f32 %v2476_v52, %v2476_v52  ;;  %v1119_v0 = vmul.f32 %v2479_v6, %v2479_v6  ;;  %v1120_v1 = vmul.f32 %v2482_v3, %v2482_v3 }
 0x205   : > { %v1129_v50 = vadd.f32 %v1114_v14, %v1113_v17  ;;  %v1121_v5 = vmul.f32 %v2485_v13, %v2485_v13  ;;  %v1122_v42 = vmul.f32 %v2488_v25, %v2488_v25  ;;  %v1123_v10 = vmul.f32 %v2490_v36, %v2490_v36 }
 0x206   : > { %v1124_v23 = vmul.f32 %v2492_v53, %v2492_v53  ;;  %v1125_v16 = vmul.f32 %v2494_v46, %v2494_v46  ;;  %v1126_v7 = vmul.f32 %v2496_v58, %v2496_v58  ;;  %v1127_v19 = vmul.f32 %v2498_v54, %v2498_v54 }
 0x207   : > { %v1130_v59 = vadd.f32 %v1129_v50, %v1115_v38  ;;  %v1128_v22 = vmul.f32 %v2500_v4, %v2500_v4  ;;  %v1181_v14 = vrot.slane %v1073_v33, %v1180_v44 }
 0x209   : > { %v1131_v35 = vadd.f32 %v1130_v59, %v1116_v57 }
 0x20b   : > { %v1132_v62 = vadd.f32 %v1131_v35, %v1117_v60 }
 0x20d   : > { %v1133_v15 = vadd.f32 %v1132_v62, %v1118_v61 }
 0x20f   : > { %v1134_v2 = vadd.f32 %v1133_v15, %v1119_v0 }
 0x211   : > { %v1135_v8 = vadd.f32 %v1134_v2, %v1120_v1 }
 0x213   : > { %v1136_v9 = vadd.f32 %v1135_v8, %v1121_v5 }
 0x215   : > { %v1137_v11 = vadd.f32 %v1136_v9, %v1122_v42 }
 0x217   : > { %v1138_v12 = vadd.f32 %v1137_v11, %v1123_v10 }
 0x219   : > { %v1139_v18 = vadd.f32 %v1138_v12, %v1124_v23 }
 0x21b   : > { %v1140_v49 = vadd.f32 %v1139_v18, %v1125_v16 }
 0x21d   : > { %v1141_v20 = vadd.f32 %v1140_v49, %v1126_v7 }
 0x21f   : > { %v1142_v31 = vadd.f32 %v1141_v20, %v1127_v19 }
 0x221   : > { %v1143_v24 = vadd.f32 %v1142_v31, %v1128_v22 }
 0x223   : > { %v1144_v26 = vrot.slane %v1143_v24, 4 }
 0x225   : > { %v1145_v27 = vadd.f32 %v1144_v26, %v1143_v24 }
 0x227   : > { %v1146_v29 = vrot.slane %v1145_v27, 2 }
 0x229   : > { %v1147_v56 = vadd.f32 %v1146_v29, %v1145_v27 }
 0x22b   : > { %v1148_v30 = vrot.slane %v1147_v56, 1 }
 0x22d   : > { %v1149_v32 = vadd.f32 %v1148_v30, %v1147_v56 }
 0x22f   : > { %v1150_v39 = vmul.f32 0.0078125, %v1149_v32 }
 0x231   : > { %v1151_v34 = vmul.f32 %v1150_v39, %v1073_v33 }
 0x233   : > { %v1152_v37 = vadd.f32 1e-05, %v1151_v34 }
 0x235   : > { %1867 = vrsqrt.f32 %v1152_v37 }
 0x23f   : > { %v1868_v63 = vpop.eup %1867 }
 0x240   : > { %v1155_v41 = vrot.slane %v1868_v63, 1 }
 0x242   : > { %v1157_v45 = vmul.f32 %v1155_v41, %v1073_v33 }
 0x244   : > { %v1161_v17 = vrot.slane %v1157_v45, %v1160_v43 }
 0x246   : > { %v1162_v38 = vmul.f32 %v1161_v17, %v2461_v47  ;;  %v1163_v50 = vmul.f32 %v1161_v17, %v2464_v48  ;;  %v1164_v57 = vmul.f32 %v1161_v17, %v2467_v28  ;;  %v1165_v59 = vmul.f32 %v1161_v17, %v2470_v55 }
 0x247   : > { %v1166_v60 = vmul.f32 %v1161_v17, %v2473_v51  ;;  %v1167_v35 = vmul.f32 %v1161_v17, %v2476_v52  ;;  %v1168_v61 = vmul.f32 %v1161_v17, %v2479_v6  ;;  %v1169_v62 = vmul.f32 %v1161_v17, %v2482_v3 }
 0x248   : > { %v1170_v0 = vmul.f32 %v1161_v17, %v2485_v13  ;;  %v1171_v15 = vmul.f32 %v1161_v17, %v2488_v25  ;;  %v1172_v47 = vmul.f32 %v1161_v17, %v2490_v36  ;;  %v1173_v48 = vmul.f32 %v1161_v17, %v2492_v53 }
 0x249   : > { %v1174_v28 = vmul.f32 %v1161_v17, %v2494_v46  ;;  %v1175_v55 = vmul.f32 %v1161_v17, %v2496_v58  ;;  %v1176_v51 = vmul.f32 %v1161_v17, %v2498_v54  ;;  %v1177_v52 = vmul.f32 %v1161_v17, %v2500_v4 }
 0x24a   : > { %v1182_v6 = vadd.f32 %v1181_v14, %v1162_v38  ;;  %v1183_v3 = vadd.f32 %v1181_v14, %v1163_v50  ;;  %v1184_v13 = vadd.f32 %v1181_v14, %v1164_v57  ;;  %v1185_v25 = vadd.f32 %v1181_v14, %v1165_v59 }
 0x24b   : > { %v1186_v36 = vadd.f32 %v1181_v14, %v1166_v60  ;;  %v1187_v53 = vadd.f32 %v1181_v14, %v1167_v35  ;;  %v1188_v46 = vadd.f32 %v1181_v14, %v1168_v61  ;;  %v1189_v58 = vadd.f32 %v1181_v14, %v1169_v62 }
 0x24c   : > { %v1190_v54 = vadd.f32 %v1181_v14, %v1170_v0  ;;  %v1191_v4 = vadd.f32 %v1181_v14, %v1171_v15  ;;  %v1192_v1 = vadd.f32 %v1181_v14, %v1172_v47  ;;  %v1193_v2 = vadd.f32 %v1181_v14, %v1173_v48  ;;  %1198 = vst [vmem:[%s2553_s20] sm:$0xff] %v1182_v6 }
 0x24d   : > { %1199 = vst [vmem:[%s2553_s20 + $0x8] sm:$0xff] %v1183_v3  ;;  %1200 = vst [vmem:[%s2553_s20 + $0x10] sm:$0xff] %v1184_v13  ;;  %v1194_v5 = vadd.f32 %v1181_v14, %v1174_v28  ;;  %v1195_v8 = vadd.f32 %v1181_v14, %v1175_v55  ;;  %v1196_v42 = vadd.f32 %v1181_v14, %v1176_v51 }
 0x24e   : > { %1201 = vst [vmem:[%s2553_s20 + $0x18] sm:$0xff] %v1185_v25  ;;  %v1197_v9 = vadd.f32 %v1181_v14, %v1177_v52  ;;  %1202 = vst [vmem:[%s2553_s20 + $0x20] sm:$0xff] %v1186_v36 }
 0x24f   : > { %1203 = vst [vmem:[%s2553_s20 + $0x28] sm:$0xff] %v1187_v53  ;;  %1204 = vst [vmem:[%s2553_s20 + $0x30] sm:$0xff] %v1188_v46 }
 0x250   : > { %1205 = vst [vmem:[%s2553_s20 + $0x38] sm:$0xff] %v1189_v58  ;;  %1206 = vst [vmem:[%s2553_s20 + $0x40] sm:$0xff] %v1190_v54 }
 0x251   : > { %1207 = vst [vmem:[%s2553_s20 + $0x48] sm:$0xff] %v1191_v4  ;;  %1208 = vst [vmem:[%s2553_s20 + $0x50] sm:$0xff] %v1192_v1 }
 0x252   : > { %1209 = vst [vmem:[%s2553_s20 + $0x58] sm:$0xff] %v1193_v2  ;;  %1210 = vst [vmem:[%s2553_s20 + $0x60] sm:$0xff] %v1194_v5 }
 0x253   : > { %1211 = vst [vmem:[%s2553_s20 + $0x68] sm:$0xff] %v1195_v8  ;;  %1212 = vst [vmem:[%s2553_s20 + $0x70] sm:$0xff] %v1196_v42 }
 0x254   : > { %1213 = vst [vmem:[%s2553_s20 + $0x78] sm:$0xff] %v1197_v9 }
 0x255   : > { %1970 = shalt.err (!%p1967_p6)
}
 0x256   : > { %s1971_s22 = scalar_lea.hbm %s2559_s11, 2048  ;;  %s1975_s25 = scalar_lea.hbm %s2623_s3, 8192 }
 0x257   : > { %p1972_p8 = scmp.ne.s32.totalorder %s2559_s11, %s1971_s22  ;;  %p1976_p9 = scmp.lt.u32.totalorder %s2559_s11, %s2623_s3 }
 0x258   : > { %p1977_p1 = scmp.lt.u32.totalorder %s1975_s25, %s1971_s22  ;;  %p1979_p2 = scmp.lt.u32.totalorder %s1971_s22, %s2559_s11 }
 0x259   : > { %p1973_p11 = pnand %p1972_p8, %p2644_p3 }
 0x25a   : > { %p1978_p13 = por %p1977_p1, %p1976_p9 }
 0x25b   : > { %p1974_p5 = pneg %p1973_p11 }
 0x25c   : > { %p1980_p0 = por %p1979_p2, %p1978_p13 }
 0x25e   : > { %p1981_p10 = pnand %p1980_p0, %p1974_p5 }
 0x260   : > { %1984 = shalt.err (!%p1981_p10)
}
 0x261   : > { %s2038_s4 = smov 128   ;;  %s2039_s17 = smov 512  }
 0x262   : > { %s2040_s20 = smov 8  }
 0x263   : > { %1805 = dma.vmem_to_hbm [thread:$0]  (%p2644_p3), %s2565_s5, 2048, %s2559_s11, %s1215_s7, %s2038_s4, %s2039_s17, %s2040_s20  }
 0x264 PF: > { %p1825_p12 = scmp.ge.s32.totalorder %s2027_s15, 2  ;;  %s1242_s24 = sand.u32 1, %s2015_s12  }
 0x265   : > { %p2645_p7 = scmp.ne.s32.totalorder %s2634_s28, 0  ;;  %s1243_s10 = scalar_lea.sflag [#allocation4], %s1242_s24 }
 0x267   : > { %p1819_p4 = pnand %p1825_p12, %p2645_p7 }
 0x269   : > { %2010 = dma.done.wait (!%p1819_p4), %s1243_s10, 2048  }
 0x26a   : > { %2012 = vsyncadd (!%p1819_p4), %s1243_s10, 4294965248  ;;  %p17_p6 = scmp.ge.s32.totalorder %s2082_s16, 6   ;;  %s2646_s12 = smov %s2019_s13 }
 0x26b   : > { %s2647_s13 = smov %s2023_s14  ;;  %s2648_s14 = smov %s2092_s19 }
 0x26c   : > { %s2649_s15 = smov %s2082_s16  ;;  %19 = sbr.rel (!%p17_p6) target bundleno = 6 (0x6), region = 93 }
 0x273   :  { %1248 = vsyncpa [#allocation3], 1 }
 0x274   :  { %1250 = vsyncpa [#allocation3 + $0x1], 1 }
 0x275   :  { %1251 = vsyncpa [#allocation6], 1 }
 0x276   :  { %1253 = vsyncpa [#allocation6 + $0x1], 1 }
 0x277   :  { %1254 = vsyncpa [#allocation4], 1 }
 0x278   :  { %1256 = vsyncpa [#allocation4 + $0x1], 1 }

</bundles_post_ra>
